<compile_context>
chip_gen: v7x
topology: tpu7x:2x2x1
jax: 0.10.0
libtpu: 0.0.40
codegen_flags: <defaults>
</compile_context>

<pallas_src>
import jax
import jax.numpy as jnp
import numpy as np
from jax.experimental import pallas as pl
from jax.experimental.pallas import tpu as pltpu


# --------------------------------------------------------------------------- #
# Host-side weight packing: 3x3 conv as 3 row-slab matmuls over a fused
# (width*channel) lane axis, with a block-Toeplitz RHS per kernel row.
# --------------------------------------------------------------------------- #

def _pack_conv_rhs(w, w_in, w_out, stride):
    """w: (3, 3, Cin, Cout) HWIO.  Returns rhs of shape (3, w_in*Cin, w_out*Cout)
    such that   out[:, j*Cout+o] = sum_ky  lhs_ky[:, x*Cin+c] * rhs[ky, x*Cin+c, j*Cout+o]
    reproduces a 3x3 'same' conv with the given stride, where lhs_ky row r holds
    padded input row (ky + stride*r) with only the real W columns stored."""
    cin, cout = w.shape[2], w.shape[3]
    xs = jnp.arange(w_in)                                   # real input column
    js = jnp.arange(w_out)                                  # output column
    kx = xs[:, None] - stride * js[None, :] + 1             # (w_in, w_out) tap index
    valid = ((kx >= 0) & (kx <= 2)).astype(w.dtype)
    g = w[:, jnp.clip(kx, 0, 2), :, :]                      # (3, w_in, w_out, Cin, Cout)
    g = g * valid[None, :, :, None, None]
    g = jnp.transpose(g, (0, 1, 3, 2, 4))                   # (3, w_in, Cin, w_out, Cout)
    return g.reshape(3, w_in * cin, w_out * cout)


def _pack_shortcut_rhs(ws, w_in, w_out, stride):
    """ws: (Cin, Cout) 1x1 conv (stride `stride`, no padding).  Same layout as
    _pack_conv_rhs; only the ky=1 (centre-row) slab is nonzero."""
    cin, cout = ws.shape
    xs = jnp.arange(w_in)
    js = jnp.arange(w_out)
    hit = (xs[:, None] == stride * js[None, :]).astype(ws.dtype)   # (w_in, w_out)
    g = hit[:, None, :, None] * ws[None, :, None, :]               # (w_in, Cin, w_out, Cout)
    g = g.reshape(w_in * cin, w_out * cout)
    z = jnp.zeros_like(g)
    return jnp.stack([z, g, z], axis=0)                            # (3, w_in*Cin, w_out*Cout)


# ------------------------------ fused kernel ------------------------------- #

def _make_block_kernel(*, stride, nb, H, W, cin, ho, wo, cout,
                       apply_bn1, equal_in_out, h1_dtype):
    hp = H + 2
    wc_in = W * cin
    wc_out = wo * cout
    m = nb * ho

    def lrelu(v):
        return jnp.where(v > 0, v, 0.1 * v)

    def kernel(x_ref, s1_ref, b1_ref, w1_ref, s2_ref, b2_ref, w2_ref,
               o_ref, h_scr, h2_scr):
        # ---- stage 1: bn1 + LeakyReLU (or raw x), staged once --------------
        x = x_ref[...]                                     # (nb, H, W*cin) f32
        h = lrelu(x * s1_ref[...] + b1_ref[...]) if apply_bn1 else x
        # Re-zero only the two H-halo rows (cheap, done every step so it is
        # correct even when the grid is split across TensorCores).
        zrow1 = jnp.zeros((nb, 1, wc_in), h1_dtype)
        h_scr[:, pl.ds(0, 1), :] = zrow1
        h_scr[:, pl.ds(hp - 1, 1), :] = zrow1
        h_scr[:, pl.ds(1, H), :] = h.astype(h1_dtype)

        # ---- stage 2: conv1 (3x3, stride) + fused 1x1 shortcut columns ------
        acc1 = None
        for ky in range(3):
            if stride == 1:
                rows = h_scr[:, pl.ds(ky, ho), :]
            else:
                rows = h_scr[:, pl.ds(ky, ho, stride=stride), :]
            lhs = rows.reshape(m, wc_in).astype(jnp.bfloat16)
            part = jnp.dot(lhs, w1_ref[ky], preferred_element_type=jnp.float32)
            acc1 = part if acc1 is None else acc1 + part   # (m, n1) f32

        # ---- stage 3: bn2 + LeakyReLU -> padded conv2 input -----------------
        y1 = lrelu(acc1[:, :wc_out] * s2_ref[...] + b2_ref[...])
        # TODO(synk): F.dropout (drop_rate > 0, training mode) would apply to y1 here.
        zrow2 = jnp.zeros((nb, 1, wc_out), jnp.bfloat16)
        h2_scr[:, pl.ds(0, 1), :] = zrow2
        h2_scr[:, pl.ds(ho + 1, 1), :] = zrow2
        h2_scr[:, pl.ds(1, ho), :] = y1.reshape(nb, ho, wc_out).astype(jnp.bfloat16)

        # ---- stage 4: conv2 (3x3, stride 1) ---------------------------------
        acc2 = None
        for ky in range(3):
            rows = h2_scr[:, pl.ds(ky, ho), :]
            part = jnp.dot(rows.reshape(m, wc_out), w2_ref[ky],
                           preferred_element_type=jnp.float32)
            acc2 = part if acc2 is None else acc2 + part   # (m, wc_out) f32

        # ---- stage 5: residual add + single lane-dense store ----------------
        if equal_in_out:
            res = x_ref[...].reshape(m, wc_out)            # raw-x identity, f32
        else:
            res = acc1[:, wc_out:]                         # fused 1x1 shortcut
        o_ref[...] = (acc2 + res).reshape(nb, ho, wc_out)

    return kernel


# ------------------------------ public wrapper ------------------------------ #

def _pick_images_per_step(n, cap=8):
    """Images per grid step: divide the batch, amortize per-step overhead,
    prefer an even number of grid steps (v7x megacore), cap for VMEM headroom."""
    divs = [d for d in range(1, min(n, cap) + 1) if n % d == 0]
    even_grid = [d for d in divs if (n // d) % 2 == 0]
    return max(even_grid) if even_grid else max(divs)


def basic_block_forward(x_nchw, params, *, stride, activate_before_residual=False,
                        drop_rate=0.0):
    """Fused WideResNet BasicBlock forward (inference; BN running stats folded)."""
    # TODO(synk): F.dropout path (drop_rate > 0, training) not implemented.
    assert drop_rate == 0.0

    x = jnp.transpose(x_nchw, (0, 2, 3, 1)).astype(jnp.float32)      # NCHW -> NHWC
    N, H, W, cin = x.shape
    cout = params["w1"].shape[-1]
    equal_in_out = (cin == cout)
    if equal_in_out:
        assert stride == 1, "identity residual requires stride == 1"

    ho = (H + 2 - 3) // stride + 1
    wo = (W + 2 - 3) // stride + 1
    assert H % 8 == 0 and ho % 8 == 0, "sublane-friendly row counts"
    wc_in, wc_out = W * cin, wo * cout
    apply_bn1 = equal_in_out or activate_before_residual

    nb = _pick_images_per_step(N)
    grid = (N // nb,)

    # Fuse W into the lane axis once in HBM (row-major -> free reshape).
    x_flat = x.reshape(N, H, wc_in)

    # Host-side packing: block-Toeplitz RHS per kernel row; bf16 MXU operands.
    w1p = _pack_conv_rhs(params["w1"], W, wo, stride)                 # (3, wc_in, wc_out)
    if not equal_in_out:
        wsp = _pack_shortcut_rhs(params["ws"].reshape(cin, cout), W, wo, stride)
        w1p = jnp.concatenate([w1p, wsp], axis=-1)                    # (3, wc_in, 2*wc_out)
    w1p = w1p.astype(jnp.bfloat16)
    w2p = _pack_conv_rhs(params["w2"], wo, wo, 1).astype(jnp.bfloat16)
    n1 = w1p.shape[-1]

    # BN affine params tiled over the fused W*C lane axis (f32 elementwise math).
    s1 = jnp.tile(params["bn1_scale"].reshape(1, cin), (1, W)).astype(jnp.float32)
    b1 = jnp.tile(params["bn1_bias"].reshape(1, cin), (1, W)).astype(jnp.float32)
    s2 = jnp.tile(params["bn2_scale"].reshape(1, cout), (1, wo)).astype(jnp.float32)
    b2 = jnp.tile(params["bn2_bias"].reshape(1, cout), (1, wo)).astype(jnp.float32)

    # bf16 staging everywhere except the stride-2 conv1 buffer, whose strided
    # sublane reads stay on the proven f32 path (cast to bf16 at the MXU).
    h1_dtype = jnp.bfloat16 if stride == 1 else jnp.float32

    kernel = _make_block_kernel(stride=stride, nb=nb, H=H, W=W, cin=cin,
                                ho=ho, wo=wo, cout=cout,
                                apply_bn1=apply_bn1, equal_in_out=equal_in_out,
                                h1_dtype=h1_dtype)

    out = pl.pallas_call(
        kernel,
        out_shape=jax.ShapeDtypeStruct((N, ho, wc_out), jnp.float32),
        grid=grid,
        in_specs=[
            pl.BlockSpec((nb, H, wc_in), lambda n: (n, 0, 0)),
            pl.BlockSpec((1, wc_in), lambda n: (0, 0)),
            pl.BlockSpec((1, wc_in), lambda n: (0, 0)),
            pl.BlockSpec((3, wc_in, n1), lambda n: (0, 0, 0)),
            pl.BlockSpec((1, wc_out), lambda n: (0, 0)),
            pl.BlockSpec((1, wc_out), lambda n: (0, 0)),
            pl.BlockSpec((3, wc_out, wc_out), lambda n: (0, 0, 0)),
        ],
        out_specs=pl.BlockSpec((nb, ho, wc_out), lambda n: (n, 0, 0)),
        scratch_shapes=[
            pltpu.VMEM((nb, H + 2, wc_in), h1_dtype),        # conv1 input (+H-halo rows)
            pltpu.VMEM((nb, ho + 2, wc_out), jnp.bfloat16),  # conv2 input (+H-halo rows)
        ],
        compiler_params=pltpu.CompilerParams(
            dimension_semantics=("parallel",)),
    )(x_flat, s1, b1, w1p, s2, b2, w2p)

    # NOTE: for chained blocks one would keep this lane-dense (N, Ho, Wo*Cout)
    # layout (and/or bf16); convert back to NCHW here to match the PyTorch API.
    out = out.reshape(N, ho, wo, cout)
    return jnp.transpose(out, (0, 3, 1, 2))


# ------------------------ params + pure-JAX reference ----------------------- #

def init_params(key, in_planes, out_planes):
    """Deterministic synthetic parameters.  BatchNorm uses eval semantics:
    running stats are folded into (scale, bias)."""
    eps = 1e-5
    ks = jax.random.split(key, 11)

    def bn_fold(kg, kb, km, kv, c):
        gamma = jax.random.uniform(kg, (c,), jnp.float32, 0.5, 1.5)
        beta = 0.1 * jax.random.normal(kb, (c,), jnp.float32)
        mean = 0.1 * jax.random.normal(km, (c,), jnp.float32)
        var = jax.random.uniform(kv, (c,), jnp.float32, 0.5, 1.5)
        scale = gamma / jnp.sqrt(var + eps)
        bias = beta - mean * scale
        return scale.reshape(1, c), bias.reshape(1, c)

    s1, b1 = bn_fold(ks[0], ks[1], ks[2], ks[3], in_planes)
    s2, b2 = bn_fold(ks[4], ks[5], ks[6], ks[7], out_planes)
    p = {
        "bn1_scale": s1, "bn1_bias": b1,
        "bn2_scale": s2, "bn2_bias": b2,
        "w1": 0.1 * jax.random.normal(ks[8], (3, 3, in_planes, out_planes), jnp.float32),
        "w2": 0.1 * jax.random.normal(ks[9], (3, 3, out_planes, out_planes), jnp.float32),
    }
    if in_planes != out_planes:
        p["ws"] = 0.1 * jax.random.normal(ks[10], (1, 1, in_planes, out_planes), jnp.float32)
    return p


def reference_forward(x_nchw, params, *, stride, activate_before_residual=False):
    """Pure-JAX reference (lax.conv) mirroring the PyTorch forward."""
    x = jnp.transpose(x_nchw, (0, 2, 3, 1)).astype(jnp.float32)
    cin = x.shape[-1]
    cout = params["w1"].shape[-1]
    equal = cin == cout

    def act(z, s, b):
        y = z * s.reshape(1, 1, 1, -1) + b.reshape(1, 1, 1, -1)
        return jnp.where(y > 0, y, 0.1 * y)

    def conv(z, w, s, pad):
        return jax.lax.conv_general_dilated(
            z, w, (s, s), pad, dimension_numbers=("NHWC", "HWIO", "NHWC"),
            precision=jax.lax.Precision.HIGHEST)

    if (not equal) and activate_before_residual:
        x = act(x, params["bn1_scale"], params["bn1_bias"])
        h = x
    elif equal:
        h = act(x, params["bn1_scale"], params["bn1_bias"])
    else:
        h = x

    out = act(conv(h, params["w1"], stride, ((1, 1), (1, 1))),
              params["bn2_scale"], params["bn2_bias"])
    out = conv(out, params["w2"], 1, ((1, 1), (1, 1)))
    res = x if equal else conv(x, params["ws"], stride, ((0, 0), (0, 0)))
    return jnp.transpose(res + out, (0, 3, 1, 2))


# ----------------------------------- main ----------------------------------- #

if __name__ == "__main__":
    key = jax.random.PRNGKey(0)
    kx, kp1, kp2, kp3 = jax.random.split(key, 4)

    # Input in PyTorch NCHW convention: (N=4, C=16, H=16, W=16)
    x = jax.random.normal(kx, (4, 16, 16, 16), jnp.float32)

    # Case 1: equalInOut (16 -> 16, stride=1)
    p1 = init_params(kp1, 16, 16)
    y1 = jax.block_until_ready(
        basic_block_forward(x, p1, stride=1, activate_before_residual=False))
    r1 = reference_forward(x, p1, stride=1, activate_before_residual=False)
    np.testing.assert_allclose(np.asarray(y1), np.asarray(r1), rtol=3e-2, atol=3e-2)

    # Case 2: 16 -> 32, stride=2, activate_before_residual=True
    p2 = init_params(kp2, 16, 32)
    y2 = jax.block_until_ready(
        basic_block_forward(x, p2, stride=2, activate_before_residual=True))
    r2 = reference_forward(x, p2, stride=2, activate_before_residual=True)
    np.testing.assert_allclose(np.asarray(y2), np.asarray(r2), rtol=3e-2, atol=3e-2)

    # Case 3: 16 -> 32, stride=2, activate_before_residual=False (raw-x conv1 path)
    p3 = init_params(kp3, 16, 32)
    y3 = jax.block_until_ready(
        basic_block_forward(x, p3, stride=2, activate_before_residual=False))
    r3 = reference_forward(x, p3, stride=2, activate_before_residual=False)
    np.testing.assert_allclose(np.asarray(y3), np.asarray(r3), rtol=3e-2, atol=3e-2)

    print("KERNEL_OK")
</pallas_src>

<mosaic_0001>
module attributes {stable_mosaic.version = 11 : i64} {
  func.func @kernel(%arg0: i32, %arg1: memref<2x16x256xf32, #tpu.memory_space<vmem>>, %arg2: memref<1x256xf32, #tpu.memory_space<vmem>>, %arg3: memref<1x256xf32, #tpu.memory_space<vmem>>, %arg4: memref<3x256x256xbf16, #tpu.memory_space<vmem>>, %arg5: memref<1x256xf32, #tpu.memory_space<vmem>>, %arg6: memref<1x256xf32, #tpu.memory_space<vmem>>, %arg7: memref<3x256x256xbf16, #tpu.memory_space<vmem>>, %arg8: memref<2x16x256xf32, #tpu.memory_space<vmem>>, %arg9: memref<2x18x256xbf16, #tpu.memory_space<vmem>>, %arg10: memref<2x18x256xbf16, #tpu.memory_space<vmem>>) attributes {dimension_semantics = [#tpu.dimension_semantics<parallel>], iteration_bounds = array<i64: 2>, scalar_prefetch = 0 : i64, scratch_operands = 2 : i64, tpu.core_type = #tpu.core_type<tc>, window_params = [{transform_indices = @transform_0, window_bounds = array<i64: 2, 16, 256>}, {pipeline_mode = #tpu.pipeline_mode<synchronous>, transform_indices = @transform_1, window_bounds = array<i64: 1, 256>}, {pipeline_mode = #tpu.pipeline_mode<synchronous>, transform_indices = @transform_2, window_bounds = array<i64: 1, 256>}, {pipeline_mode = #tpu.pipeline_mode<synchronous>, transform_indices = @transform_3, window_bounds = array<i64: 3, 256, 256>}, {pipeline_mode = #tpu.pipeline_mode<synchronous>, transform_indices = @transform_4, window_bounds = array<i64: 1, 256>}, {pipeline_mode = #tpu.pipeline_mode<synchronous>, transform_indices = @transform_5, window_bounds = array<i64: 1, 256>}, {pipeline_mode = #tpu.pipeline_mode<synchronous>, transform_indices = @transform_6, window_bounds = array<i64: 3, 256, 256>}, {transform_indices = @transform_7, window_bounds = array<i64: 2, 16, 256>}]} {
    %c0 = arith.constant 0 : index
    %c0_0 = arith.constant 0 : index
    %c0_1 = arith.constant 0 : index
    %0 = vector.load %arg1[%c0, %c0_0, %c0_1] : memref<2x16x256xf32, #tpu.memory_space<vmem>>, vector<2x16x256xf32>
    %c0_2 = arith.constant 0 : index
    %c0_3 = arith.constant 0 : index
    %1 = vector.load %arg2[%c0_2, %c0_3] : memref<1x256xf32, #tpu.memory_space<vmem>>, vector<1x256xf32>
    %2 = vector.shape_cast %1 : vector<1x256xf32> to vector<1x1x256xf32>
    %3 = vector.broadcast %2 : vector<1x1x256xf32> to vector<2x16x256xf32>
    %4 = arith.mulf %0, %3 : vector<2x16x256xf32>
    %c0_4 = arith.constant 0 : index
    %c0_5 = arith.constant 0 : index
    %5 = vector.load %arg3[%c0_4, %c0_5] : memref<1x256xf32, #tpu.memory_space<vmem>>, vector<1x256xf32>
    %6 = vector.shape_cast %5 : vector<1x256xf32> to vector<1x1x256xf32>
    %7 = vector.broadcast %6 : vector<1x1x256xf32> to vector<2x16x256xf32>
    %8 = arith.addf %4, %7 : vector<2x16x256xf32>
    %cst = arith.constant 0.000000e+00 : f32
    %9 = vector.broadcast %cst : f32 to vector<2x16x256xf32>
    %10 = arith.cmpf ogt, %8, %9 : vector<2x16x256xf32>
    %cst_6 = arith.constant 1.000000e-01 : f32
    %11 = vector.broadcast %cst_6 : f32 to vector<2x16x256xf32>
    %12 = arith.mulf %11, %8 : vector<2x16x256xf32>
    %13 = arith.select %10, %8, %12 : vector<2x16x256xi1>, vector<2x16x256xf32>
    %cst_7 = arith.constant 0.000000e+00 : bf16
    %14 = vector.broadcast %cst_7 : bf16 to vector<2x1x256xbf16>
    %c0_8 = arith.constant 0 : index
    %c0_9 = arith.constant 0 : index
    %c0_10 = arith.constant 0 : index
    %15 = vector.load %arg9[%c0_8, %c0_9, %c0_10] : memref<2x18x256xbf16, #tpu.memory_space<vmem>>, vector<2x1x256xbf16>
    tpu.vector_store %arg9[%c0_8, %c0_9, %c0_10], %14 {strides = array<i32>} : memref<2x18x256xbf16, #tpu.memory_space<vmem>>, vector<2x1x256xbf16>,
    %c0_11 = arith.constant 0 : index
    %c17 = arith.constant 17 : index
    %c0_12 = arith.constant 0 : index
    %16 = vector.load %arg9[%c0_11, %c17, %c0_12] : memref<2x18x256xbf16, #tpu.memory_space<vmem>>, vector<2x1x256xbf16>
    tpu.vector_store %arg9[%c0_11, %c17, %c0_12], %14 {strides = array<i32>} : memref<2x18x256xbf16, #tpu.memory_space<vmem>>, vector<2x1x256xbf16>,
    %17 = arith.truncf %13 : vector<2x16x256xf32> to vector<2x16x256xbf16>
    %c0_13 = arith.constant 0 : index
    %c1 = arith.constant 1 : index
    %c0_14 = arith.constant 0 : index
    %18 = vector.load %arg9[%c0_13, %c1, %c0_14] : memref<2x18x256xbf16, #tpu.memory_space<vmem>>, vector<2x16x256xbf16>
    tpu.vector_store %arg9[%c0_13, %c1, %c0_14], %17 {strides = array<i32>} : memref<2x18x256xbf16, #tpu.memory_space<vmem>>, vector<2x16x256xbf16>,
    %c0_15 = arith.constant 0 : index
    %c0_16 = arith.constant 0 : index
    %c0_17 = arith.constant 0 : index
    %19 = vector.load %arg9[%c0_15, %c0_16, %c0_17] : memref<2x18x256xbf16, #tpu.memory_space<vmem>>, vector<2x16x256xbf16>
    %20 = vector.shape_cast %19 : vector<2x16x256xbf16> to vector<32x256xbf16>
    %c0_18 = arith.constant 0 : index
    %c0_19 = arith.constant 0 : index
    %c0_20 = arith.constant 0 : index
    %21 = vector.load %arg4[%c0_18, %c0_19, %c0_20] : memref<3x256x256xbf16, #tpu.memory_space<vmem>>, vector<1x256x256xbf16>
    %22 = vector.shape_cast %21 : vector<1x256x256xbf16> to vector<256x256xbf16>
    %cst_21 = arith.constant dense<0.000000e+00> : vector<32x256xf32>
    %23 = tpu.matmul %20, %22, %cst_21 {dimension_numbers = #tpu.dot_dimension_numbers<[1], [0], [0], [1], [0, 0, 1, 1], [], []>} : vector<32x256xbf16>, vector<256x256xbf16>, vector<32x256xf32> -> vector<32x256xf32>
    %c0_22 = arith.constant 0 : index
    %c1_23 = arith.constant 1 : index
    %c0_24 = arith.constant 0 : index
    %24 = vector.load %arg9[%c0_22, %c1_23, %c0_24] : memref<2x18x256xbf16, #tpu.memory_space<vmem>>, vector<2x16x256xbf16>
    %25 = vector.shape_cast %24 : vector<2x16x256xbf16> to vector<32x256xbf16>
    %c1_25 = arith.constant 1 : index
    %c0_26 = arith.constant 0 : index
    %c0_27 = arith.constant 0 : index
    %26 = vector.load %arg4[%c1_25, %c0_26, %c0_27] : memref<3x256x256xbf16, #tpu.memory_space<vmem>>, vector<1x256x256xbf16>
    %27 = vector.shape_cast %26 : vector<1x256x256xbf16> to vector<256x256xbf16>
    %cst_28 = arith.constant dense<0.000000e+00> : vector<32x256xf32>
    %28 = tpu.matmul %25, %27, %cst_28 {dimension_numbers = #tpu.dot_dimension_numbers<[1], [0], [0], [1], [0, 0, 1, 1], [], []>} : vector<32x256xbf16>, vector<256x256xbf16>, vector<32x256xf32> -> vector<32x256xf32>
    %29 = arith.addf %23, %28 : vector<32x256xf32>
    %c0_29 = arith.constant 0 : index
    %c2 = arith.constant 2 : index
    %c0_30 = arith.constant 0 : index
    %30 = vector.load %arg9[%c0_29, %c2, %c0_30] : memref<2x18x256xbf16, #tpu.memory_space<vmem>>, vector<2x16x256xbf16>
    %31 = vector.shape_cast %30 : vector<2x16x256xbf16> to vector<32x256xbf16>
    %c2_31 = arith.constant 2 : index
    %c0_32 = arith.constant 0 : index
    %c0_33 = arith.constant 0 : index
    %32 = vector.load %arg4[%c2_31, %c0_32, %c0_33] : memref<3x256x256xbf16, #tpu.memory_space<vmem>>, vector<1x256x256xbf16>
    %33 = vector.shape_cast %32 : vector<1x256x256xbf16> to vector<256x256xbf16>
    %cst_34 = arith.constant dense<0.000000e+00> : vector<32x256xf32>
    %34 = tpu.matmul %31, %33, %cst_34 {dimension_numbers = #tpu.dot_dimension_numbers<[1], [0], [0], [1], [0, 0, 1, 1], [], []>} : vector<32x256xbf16>, vector<256x256xbf16>, vector<32x256xf32> -> vector<32x256xf32>
    %35 = arith.addf %29, %34 : vector<32x256xf32>
    %c0_35 = arith.constant 0 : index
    %c0_36 = arith.constant 0 : index
    %36 = vector.load %arg5[%c0_35, %c0_36] : memref<1x256xf32, #tpu.memory_space<vmem>>, vector<1x256xf32>
    %37 = vector.broadcast %36 : vector<1x256xf32> to vector<32x256xf32>
    %38 = arith.mulf %35, %37 : vector<32x256xf32>
    %c0_37 = arith.constant 0 : index
    %c0_38 = arith.constant 0 : index
    %39 = vector.load %arg6[%c0_37, %c0_38] : memref<1x256xf32, #tpu.memory_space<vmem>>, vector<1x256xf32>
    %40 = vector.broadcast %39 : vector<1x256xf32> to vector<32x256xf32>
    %41 = arith.addf %38, %40 : vector<32x256xf32>
    %cst_39 = arith.constant 0.000000e+00 : f32
    %42 = vector.broadcast %cst_39 : f32 to vector<32x256xf32>
    %43 = arith.cmpf ogt, %41, %42 : vector<32x256xf32>
    %cst_40 = arith.constant 1.000000e-01 : f32
    %44 = vector.broadcast %cst_40 : f32 to vector<32x256xf32>
    %45 = arith.mulf %44, %41 : vector<32x256xf32>
    %46 = arith.select %43, %41, %45 : vector<32x256xi1>, vector<32x256xf32>
    %cst_41 = arith.constant 0.000000e+00 : bf16
    %47 = vector.broadcast %cst_41 : bf16 to vector<2x1x256xbf16>
    %c0_42 = arith.constant 0 : index
    %c0_43 = arith.constant 0 : index
    %c0_44 = arith.constant 0 : index
    %48 = vector.load %arg10[%c0_42, %c0_43, %c0_44] : memref<2x18x256xbf16, #tpu.memory_space<vmem>>, vector<2x1x256xbf16>
    tpu.vector_store %arg10[%c0_42, %c0_43, %c0_44], %47 {strides = array<i32>} : memref<2x18x256xbf16, #tpu.memory_space<vmem>>, vector<2x1x256xbf16>,
    %c0_45 = arith.constant 0 : index
    %c17_46 = arith.constant 17 : index
    %c0_47 = arith.constant 0 : index
    %49 = vector.load %arg10[%c0_45, %c17_46, %c0_47] : memref<2x18x256xbf16, #tpu.memory_space<vmem>>, vector<2x1x256xbf16>
    tpu.vector_store %arg10[%c0_45, %c17_46, %c0_47], %47 {strides = array<i32>} : memref<2x18x256xbf16, #tpu.memory_space<vmem>>, vector<2x1x256xbf16>,
    %50 = vector.shape_cast %46 : vector<32x256xf32> to vector<2x16x256xf32>
    %51 = arith.truncf %50 : vector<2x16x256xf32> to vector<2x16x256xbf16>
    %c0_48 = arith.constant 0 : index
    %c1_49 = arith.constant 1 : index
    %c0_50 = arith.constant 0 : index
    %52 = vector.load %arg10[%c0_48, %c1_49, %c0_50] : memref<2x18x256xbf16, #tpu.memory_space<vmem>>, vector<2x16x256xbf16>
    tpu.vector_store %arg10[%c0_48, %c1_49, %c0_50], %51 {strides = array<i32>} : memref<2x18x256xbf16, #tpu.memory_space<vmem>>, vector<2x16x256xbf16>,
    %c0_51 = arith.constant 0 : index
    %c0_52 = arith.constant 0 : index
    %c0_53 = arith.constant 0 : index
    %53 = vector.load %arg10[%c0_51, %c0_52, %c0_53] : memref<2x18x256xbf16, #tpu.memory_space<vmem>>, vector<2x16x256xbf16>
    %54 = vector.shape_cast %53 : vector<2x16x256xbf16> to vector<32x256xbf16>
    %c0_54 = arith.constant 0 : index
    %c0_55 = arith.constant 0 : index
    %c0_56 = arith.constant 0 : index
    %55 = vector.load %arg7[%c0_54, %c0_55, %c0_56] : memref<3x256x256xbf16, #tpu.memory_space<vmem>>, vector<1x256x256xbf16>
    %56 = vector.shape_cast %55 : vector<1x256x256xbf16> to vector<256x256xbf16>
    %cst_57 = arith.constant dense<0.000000e+00> : vector<32x256xf32>
    %57 = tpu.matmul %54, %56, %cst_57 {dimension_numbers = #tpu.dot_dimension_numbers<[1], [0], [0], [1], [0, 0, 1, 1], [], []>} : vector<32x256xbf16>, vector<256x256xbf16>, vector<32x256xf32> -> vector<32x256xf32>
    %c0_58 = arith.constant 0 : index
    %c1_59 = arith.constant 1 : index
    %c0_60 = arith.constant 0 : index
    %58 = vector.load %arg10[%c0_58, %c1_59, %c0_60] : memref<2x18x256xbf16, #tpu.memory_space<vmem>>, vector<2x16x256xbf16>
    %59 = vector.shape_cast %58 : vector<2x16x256xbf16> to vector<32x256xbf16>
    %c1_61 = arith.constant 1 : index
    %c0_62 = arith.constant 0 : index
    %c0_63 = arith.constant 0 : index
    %60 = vector.load %arg7[%c1_61, %c0_62, %c0_63] : memref<3x256x256xbf16, #tpu.memory_space<vmem>>, vector<1x256x256xbf16>
    %61 = vector.shape_cast %60 : vector<1x256x256xbf16> to vector<256x256xbf16>
    %cst_64 = arith.constant dense<0.000000e+00> : vector<32x256xf32>
    %62 = tpu.matmul %59, %61, %cst_64 {dimension_numbers = #tpu.dot_dimension_numbers<[1], [0], [0], [1], [0, 0, 1, 1], [], []>} : vector<32x256xbf16>, vector<256x256xbf16>, vector<32x256xf32> -> vector<32x256xf32>
    %63 = arith.addf %57, %62 : vector<32x256xf32>
    %c0_65 = arith.constant 0 : index
    %c2_66 = arith.constant 2 : index
    %c0_67 = arith.constant 0 : index
    %64 = vector.load %arg10[%c0_65, %c2_66, %c0_67] : memref<2x18x256xbf16, #tpu.memory_space<vmem>>, vector<2x16x256xbf16>
    %65 = vector.shape_cast %64 : vector<2x16x256xbf16> to vector<32x256xbf16>
    %c2_68 = arith.constant 2 : index
    %c0_69 = arith.constant 0 : index
    %c0_70 = arith.constant 0 : index
    %66 = vector.load %arg7[%c2_68, %c0_69, %c0_70] : memref<3x256x256xbf16, #tpu.memory_space<vmem>>, vector<1x256x256xbf16>
    %67 = vector.shape_cast %66 : vector<1x256x256xbf16> to vector<256x256xbf16>
    %cst_71 = arith.constant dense<0.000000e+00> : vector<32x256xf32>
    %68 = tpu.matmul %65, %67, %cst_71 {dimension_numbers = #tpu.dot_dimension_numbers<[1], [0], [0], [1], [0, 0, 1, 1], [], []>} : vector<32x256xbf16>, vector<256x256xbf16>, vector<32x256xf32> -> vector<32x256xf32>
    %69 = arith.addf %63, %68 : vector<32x256xf32>
    %c0_72 = arith.constant 0 : index
    %c0_73 = arith.constant 0 : index
    %c0_74 = arith.constant 0 : index
    %70 = vector.load %arg1[%c0_72, %c0_73, %c0_74] : memref<2x16x256xf32, #tpu.memory_space<vmem>>, vector<2x16x256xf32>
    %71 = vector.shape_cast %70 : vector<2x16x256xf32> to vector<32x256xf32>
    %72 = arith.addf %69, %71 : vector<32x256xf32>
    %73 = vector.shape_cast %72 : vector<32x256xf32> to vector<2x16x256xf32>
    %c0_75 = arith.constant 0 : index
    %c0_76 = arith.constant 0 : index
    %c0_77 = arith.constant 0 : index
    %74 = vector.load %arg8[%c0_75, %c0_76, %c0_77] : memref<2x16x256xf32, #tpu.memory_space<vmem>>, vector<2x16x256xf32>
    tpu.vector_store %arg8[%c0_75, %c0_76, %c0_77], %73 {strides = array<i32>} : memref<2x16x256xf32, #tpu.memory_space<vmem>>, vector<2x16x256xf32>,
    return
  }
  func.func @transform_0(%arg0: i32) -> (i32, i32, i32) {
    %c0_i32 = arith.constant 0 : i32
    %c0_i32_0 = arith.constant 0 : i32
    %c0_i32_1 = arith.constant 0 : i32
    return %arg0, %c0_i32, %c0_i32_0 : i32, i32, i32
  }
  func.func @transform_1(%arg0: i32) -> (i32, i32) {
    %c0_i32 = arith.constant 0 : i32
    %c0_i32_0 = arith.constant 0 : i32
    %c0_i32_1 = arith.constant 0 : i32
    return %c0_i32, %c0_i32_0 : i32, i32
  }
  func.func @transform_2(%arg0: i32) -> (i32, i32) {
    %c0_i32 = arith.constant 0 : i32
    %c0_i32_0 = arith.constant 0 : i32
    %c0_i32_1 = arith.constant 0 : i32
    return %c0_i32, %c0_i32_0 : i32, i32
  }
  func.func @transform_3(%arg0: i32) -> (i32, i32, i32) {
    %c0_i32 = arith.constant 0 : i32
    %c0_i32_0 = arith.constant 0 : i32
    %c0_i32_1 = arith.constant 0 : i32
    %c0_i32_2 = arith.constant 0 : i32
    return %c0_i32, %c0_i32_0, %c0_i32_1 : i32, i32, i32
  }
  func.func @transform_4(%arg0: i32) -> (i32, i32) {
    %c0_i32 = arith.constant 0 : i32
    %c0_i32_0 = arith.constant 0 : i32
    %c0_i32_1 = arith.constant 0 : i32
    return %c0_i32, %c0_i32_0 : i32, i32
  }
  func.func @transform_5(%arg0: i32) -> (i32, i32) {
    %c0_i32 = arith.constant 0 : i32
    %c0_i32_0 = arith.constant 0 : i32
    %c0_i32_1 = arith.constant 0 : i32
    return %c0_i32, %c0_i32_0 : i32, i32
  }
  func.func @transform_6(%arg0: i32) -> (i32, i32, i32) {
    %c0_i32 = arith.constant 0 : i32
    %c0_i32_0 = arith.constant 0 : i32
    %c0_i32_1 = arith.constant 0 : i32
    %c0_i32_2 = arith.constant 0 : i32
    return %c0_i32, %c0_i32_0, %c0_i32_1 : i32, i32, i32
  }
  func.func @transform_7(%arg0: i32) -> (i32, i32, i32) {
    %c0_i32 = arith.constant 0 : i32
    %c0_i32_0 = arith.constant 0 : i32
    %c0_i32_1 = arith.constant 0 : i32
    return %arg0, %c0_i32, %c0_i32_0 : i32, i32, i32
  }
}

</mosaic_0001>

<bundles_post_ra>
// kernel: tpu_custom_call.1
= control target key start
LH: loop header
LB: loop body
LE: loop exit
PB: predicated region body
PF: predicated region fallthrough
CT: control target
= control target key end

     0   :  { %12 = vsyncpa [#allocation5], 0  ;;  %s3945_s0 = inlined_call_operand.hbm [shape: f32[4,16,256], index: 0, kind: input, shape index: {}]   ;;  %s3946_s1 = inlined_call_operand.vmem [shape: f32[1,256], index: 1, kind: input, shape index: {}]   ;;  %s3947_s2 = inlined_call_operand.vmem [shape: f32[1,256], index: 2, kind: input, shape index: {}]   ;;  %s3948_s3 = inlined_call_operand.hbm [shape: bf16[3,256,256], index: 3, kind: input, shape index: {}]   ;;  %s3949_s4 = inlined_call_operand.vmem [shape: f32[1,256], index: 4, kind: input, shape index: {}]   ;;  %s3950_s5 = inlined_call_operand.vmem [shape: f32[1,256], index: 5, kind: input, shape index: {}]   ;;  %s3951_s6 = inlined_call_operand.hbm [shape: bf16[3,256,256], index: 6, kind: input, shape index: {}]   ;;  %s3952_s7 = inlined_call_operand.hbm [shape: f32[4,16,256], index: 7, kind: output, shape index: {}]  }
   0x1   :  { %14 = vsyncpa [#allocation5 + $0x1], 0 }
   0x2   :  { %15 = vsyncpa [#allocation8], 0 }
   0x3   :  { %16 = vsyncpa [#allocation6], 0 }
   0x4   :  { %18 = vsyncpa [#allocation6 + $0x1], 0  ;;  %s3397_s24 = smov 0   ;;  %s3399_s25 = smov 0  }
   0x5   :  { %s3401_s26 = smov 0   ;;  %s3403_s27 = smov 0  }
   0x6 LB: > { %s3418_s28 = sadd.s32 4294967295, %s3345_s27   ;;  %s2536_s29 = sadd.s32 4294967294, %s3345_s27   ;;  %s3345_s27 = sphi %s3403_s27, %s3984_s27   ;;  %s3341_s26 = sphi %s3401_s26, %s3983_s26   ;;  %s3337_s25 = sphi %s3399_s25, %s3982_s25   ;;  %s3333_s24 = sphi %s3397_s24, %s3981_s24  }
   0x7   : > { %p44_p0 = scmp.ne.s32.totalorder %s3337_s25, %s3333_s24  ;;  %p3953_p1 = scmp.eq.s32.totalorder %s3418_s28, 0 }
   0x8   : > { %p200_p3 = scmp.eq.s32.totalorder %s2536_s29, 1  ;;  %p2537_p5 = scmp.ge.s32.totalorder %s3345_s27, 1 }
   0x9   : > { %p3427_p4 = por %p3953_p1, %p44_p0  ;;  %p207_p7 = scmp.lt.s32.totalorder %s3345_s27, 3 }
   0xa   : > { %p3432_p6 = por %p200_p3, %p44_p0  ;;  %s3347_s10 = smov [#allocation7]  }
   0xb   : > { %s3956_s30 = scalar_select %p3427_p4, 1, 0 }
   0xc   : > { %s3957_s8 = scalar_select %p3432_p6, 1, 0 }
   0xd   : > { %p3437_p8 = pnand %p2537_p5, %p207_p7  ;;  %s225_s11 = sshll.u32 %s3347_s10, 4  ;;  %s3441_s11 = int_to_ptr.vmem [resolvable:$true] %s225_s11 }
   0xe   : > { %s3348_s13 = smov [#allocation9]   ;;  %s3189_s17 = scalar_lea.hbm %s3948_s3, 12288 }
   0xf   : > { %p2840_p9 = pneg %p3437_p8  ;;  %s244_s14 = sshll.u32 %s3348_s13, 4  ;;  %s3452_s14 = int_to_ptr.vmem [resolvable:$true] %s244_s14 }
  0x10   : > { %p3190_p12 = scmp.ne.s32.totalorder %s3948_s3, %s3189_s17  ;;  %p3196_p5 = scmp.lt.u32.totalorder %s3189_s17, %s3948_s3 }
  0x11   : > { %p3448_p11 = pnand %p2840_p9, %p3953_p1 }
  0x13   : > { %p3191_p13 = pneg %p3448_p11 }
  0x15   : > { %p3192_p0 = pnand %p3191_p13, %p3190_p12 }
  0x17   : > { %p3193_p3 = pneg %p3192_p0 }
  0x19   : > { %p3198_p7 = pnand %p3196_p5, %p3193_p3 }
  0x1b   : > { %3201 = shalt.err (!%p3198_p7)
}
  0x1c   : > { %s3202_s22 = scalar_lea.vmem %s3441_s11, 12288  ;;  %p3210_p2 = scmp.lt.s32.totalorder %s3441_s11, %s3441_s11 }
  0x1d   : > { %p3203_p9 = scmp.ne.s32.totalorder %s3441_s11, %s3202_s22  ;;  %p3211_p12 = scmp.lt.s32.totalorder %s3202_s22, %s3202_s22 }
  0x1f   : > { %p3205_p10 = pnand %p3203_p9, %p3191_p13  ;;  %p3212_p0 = por %p3211_p12, %p3210_p2 }
  0x21   : > { %p3206_p1 = pneg %p3205_p10 }
  0x23   : > { %p3213_p6 = pnand %p3212_p0, %p3206_p1 }
  0x25   : > { %3216 = shalt.err (!%p3213_p6)
}
  0x26   : > { %s3349_s23 = smov 128   ;;  %s3350_s29 = smov 8  }
  0x27   : > { %2843 = dma.hbm_to_vmem [thread:$0]  (!%p3448_p11), %s3948_s3, 12288, %s3441_s11, [#allocation8], %s3349_s23, %s3349_s23, %s3350_s29  }
  0x28   : > { %s3217_s17 = scalar_lea.hbm %s3951_s6, 12288 }
  0x29   : > { %p3218_p2 = scmp.ne.s32.totalorder %s3951_s6, %s3217_s17  ;;  %p3224_p10 = scmp.lt.u32.totalorder %s3217_s17, %s3951_s6 }
  0x2b   : > { %p3220_p1 = pnand %p3218_p2, %p3191_p13 }
  0x2d   : > { %p3221_p6 = pneg %p3220_p1 }
  0x2f   : > { %p3226_p3 = pnand %p3224_p10, %p3221_p6 }
  0x31   : > { %3229 = shalt.err (!%p3226_p3)
}
  0x32   : > { %s3230_s11 = scalar_lea.vmem %s3452_s14, 12288  ;;  %p3238_p12 = scmp.lt.s32.totalorder %s3452_s14, %s3452_s14 }
  0x33   : > { %p3231_p5 = scmp.ne.s32.totalorder %s3452_s14, %s3230_s11  ;;  %p3239_p0 = scmp.lt.s32.totalorder %s3230_s11, %s3230_s11 }
  0x35   : > { %p3233_p7 = pnand %p3231_p5, %p3191_p13  ;;  %p3240_p2 = por %p3239_p0, %p3238_p12 }
  0x37   : > { %p3234_p9 = pneg %p3233_p7 }
  0x39   : > { %p3241_p1 = pnand %p3240_p2, %p3234_p9 }
  0x3b   : > { %3244 = shalt.err (!%p3241_p1)
}
  0x3c   : > { %2846 = dma.hbm_to_vmem [thread:$0]  (!%p3448_p11), %s3951_s6, 12288, %s3452_s14, [#allocation8], %s3349_s23, %s3349_s23, %s3350_s29  }
  0x3d   : > { %s3507_s13 = sadd.s32 1, %s3345_s27   ;;  %s31_s12 = sadd.s32 1, %s3341_s26 }
  0x3e   : > { %s28_s15 = ssub.s32 %s3345_s27, %s3507_s13  ;;  %p38_p13 = scmp.ne.s32.totalorder %s3341_s26, %s3337_s25 }
  0x3f   : > { %p29_p6 = scmp.eq.s32.totalorder %s28_s15, 0  ;;  %p39_p10 = scmp.eq.s32.totalorder %s3345_s27, 0 }
  0x40   : > { %p3960_p3 = scmp.eq.s32.totalorder %s3418_s28, 1  ;;  %p2857_p7 = scmp.lt.s32.totalorder %s3345_s27, 2 }
  0x41   : > { %s3523_s17 = scalar_select %p29_p6, %s3341_s26, %s31_s12  }
  0x42   : > { %p3517_p5 = por %p3960_p3, %p38_p13  ;;  %p40_p9 = por %p39_p10, %p38_p13 }
  0x43   : > { %s258_s18 = sand.u32 1, %s3341_s26   ;;  %s2785_s14 = sshll.u32 %s3345_s27, 10 }
  0x44   : > { %s3961_s16 = scalar_select %p3517_p5, 1, 0 }
  0x45   : > { %s2541_s19 = sshll.u32 %s258_s18, 6  ;;  %s3530_s20 = scalar_lea.hbm %s3945_s0, %s2785_s14 }
  0x46   : > { %s262_s21 = scalar_lea.vmem [#allocation4], %s2541_s19  ;;  %p3534_p11 = pnand %p2857_p7, %p40_p9 }
  0x47   : > { %s270_s11 = sshll.u32 %s262_s21, 4  ;;  %s3538_s10 = scalar_lea.sflag [#allocation5], %s258_s18  ;;  %s3532_s11 = int_to_ptr.vmem [resolvable:$true] %s270_s11 }
  0x48   : > { %s3245_s12 = scalar_lea.hbm %s3530_s20, 1024  ;;  %p3247_p0 = pneg %p3534_p11 }
  0x49   : > { %p3246_p12 = scmp.ne.s32.totalorder %s3530_s20, %s3245_s12  ;;  %s3250_s14 = scalar_lea.hbm %s3945_s0, 2048 }
  0x4a   : > { %p3251_p13 = scmp.lt.u32.totalorder %s3530_s20, %s3945_s0  ;;  %p3252_p6 = scmp.lt.u32.totalorder %s3250_s14, %s3245_s12 }
  0x4b   : > { %p3248_p2 = pnand %p3247_p0, %p3246_p12  ;;  %p3254_p3 = scmp.lt.u32.totalorder %s3245_s12, %s3530_s20 }
  0x4c   : > { %p3253_p10 = por %p3252_p6, %p3251_p13 }
  0x4d   : > { %p3249_p1 = pneg %p3248_p2 }
  0x4e   : > { %p3255_p7 = por %p3254_p3, %p3253_p10 }
  0x50   : > { %p3256_p9 = pnand %p3255_p7, %p3249_p1 }
  0x52   : > { %3259 = shalt.err (!%p3256_p9)
}
  0x53   : > { %s3260_s18 = scalar_lea.vmem %s3532_s11, 1024  ;;  %s3351_s21 = smov [#allocation4]  }
  0x54   : > { %p3261_p12 = scmp.ne.s32.totalorder %s3532_s11, %s3260_s18  ;;  %s3265_s15 = sshll.u32 %s3351_s21, 4  ;;  %s3266_s15 = int_to_ptr.vmem [resolvable:$false] %s3265_s15 }
  0x55   : > { %s3267_s19 = scalar_lea.vmem %s3266_s15, 2048  ;;  %p3268_p4 = scmp.lt.s32.totalorder %s3532_s11, %s3266_s15 }
  0x56   : > { %p3263_p2 = pnand %p3261_p12, %p3247_p0  ;;  %p3269_p13 = scmp.lt.s32.totalorder %s3267_s19, %s3260_s18 }
  0x58   : > { %p3264_p5 = pneg %p3263_p2  ;;  %p3270_p6 = por %p3269_p13, %p3268_p4 }
  0x5a   : > { %p3271_p10 = pnand %p3270_p6, %p3264_p5 }
  0x5c   : > { %3274 = shalt.err (!%p3271_p10)
}
  0x5d   : > { %s3352_s12 = smov 256   ;;  %s3353_s14 = smov 16  }
  0x5e   : > { %2850 = dma.hbm_to_vmem [thread:$0]  (!%p3534_p11), %s3530_s20, 1024, %s3532_s11, %s3538_s10, %s3352_s12, %s3352_s12, %s3353_s14  }
  0x5f   : > { %282 = sbr.rel (%p3437_p8) target bundleno = 914 (0x392), region = 48  ;;  %s3569_s23 = sand.u32 (!%p3437_p8), 1, %s3337_s25  }
  0x60   : > { %s2546_s29 = sshll.u32 (!%p3437_p8), %s3569_s23, 6  ;;  %s285_s18 = scalar_lea.sflag (!%p3437_p8), [#allocation5], %s3569_s23 }
  0x61   : > { %s3575_s21 = scalar_lea.vmem (!%p3437_p8), [#allocation4], %s2546_s29  ;;  %p3963_p4 = scmp.ne.s32.totalorder (!%p3437_p8), %s3956_s30, 0 }
  0x66   : > { %3320 = dma.done.wait (%p3963_p4), %s285_s18, 1024  }
  0x67   : > { %3322 = vsyncadd (%p3963_p4), %s285_s18, 4294966272  ;;  %p3964_p5 = scmp.eq.s32.totalorder %s3418_s28, 0 }
  0x69   : > { %3324 = dma.done.wait (%p3964_p5), [#allocation8], 24576   ;;  %p3965_p8 = pmov %p3964_p5 }
  0x6a   : > { %v2901_v0 = vld [vmem:[#allocation7 + $0x104] ss:$8 sps:$4 sm:$0xff]   ;;  %v2903_v1 = vld [vmem:[#allocation7 + $0x100] ss:$8 sps:$4 sm:$0xff]   ;;  %v2904_v2 = vld [vmem:[#allocation7 + $0x114] ss:$8 sps:$4 sm:$0xff]   ;;  %v340_v8 = vlaneseq }
  0x6b   : > { %3326 = vsyncadd (%p3965_p8), [#allocation8], 4294942720  ;;  %805 = vmatprep.subr.bf16.mxu0 %v2901_v0  ;;  %v2906_v3 = vld [vmem:[#allocation7 + $0x110] ss:$8 sps:$4 sm:$0xff]   ;;  %v2907_v4 = vld [vmem:[#allocation7 + $0x124] ss:$8 sps:$4 sm:$0xff]  }
  0x6c   : > { %806 = vmatpush1.bf16.msra.mxu0 %v2903_v1  ;;  %v2909_v5 = vld [vmem:[#allocation7 + $0x120] ss:$8 sps:$4 sm:$0xff]   ;;  %v2910_v6 = vld [vmem:[#allocation7 + $0x134] ss:$8 sps:$4 sm:$0xff]   ;;  %vm403_vm0 = vsmask.f32 256 }
  0x6d   : > { %807 = vmatprep.subr.bf16.mxu0 %v2904_v2  ;;  %vm402_vm1 = vcmask 1040384   ;;  %vm406_vm2 = vsmask.f32 4352  ;;  %v2912_v7 = vld [vmem:[#allocation7 + $0x130] ss:$8 sps:$4 sm:$0xff]   ;;  %vm405_vm4 = vcmask 1044484  }
  0x6e   : > { %vm404_vm3 = vmand %vm402_vm1, %vm403_vm0  ;;  %vm415_vm5 = vsmask.f32 7938  ;;  %v2913_v9 = vld [vmem:[#allocation7 + $0x144] ss:$8 sps:$4 sm:$0xff]   ;;  %vm417_vm6 = vsmask.f32 7954 }
  0x6f   : > { %vm407_vm7 = vmand %vm405_vm4, %vm406_vm2  ;;  %v2915_v10 = vld [vmem:[#allocation7 + $0x140] ss:$8 sps:$4 sm:$0xff]   ;;  %v341_v11 = vshrl.u32 %v340_v8, 7  ;;  %v2916_v12 = vld [vmem:[#allocation7 + $0x154] ss:$8 sps:$4 sm:$0xff]   ;;  %vm488_vm12 = vcmask 1043456  }
  0x70   : > { %808 = vmatpush1.bf16.msra.mxu0 %v2906_v3  ;;  %vm416_vm8 = vmand %vm402_vm1, %vm415_vm5  ;;  %v2918_v14 = vld [vmem:[#allocation7 + $0x150] ss:$8 sps:$4 sm:$0xff]   ;;  %v2919_v18 = vld [vmem:[#allocation7 + $0x164] ss:$8 sps:$4 sm:$0xff]   ;;  %vm490_vm2 = vcmask 1047556   ;;  %s326_s12 = scalar_lea.vmem [#allocation10], %s2546_s29 }
  0x71   : > { %809 = vmatprep.subr.bf16.mxu0 %v2907_v4  ;;  %vm418_vm9 = vmand %vm405_vm4, %vm417_vm6  ;;  %v3592_v15 = vsub.s32 0, %v341_v11  ;;  %v3594_v16 = vsub.s32 1, %v341_v11  ;;  %v2921_v19 = vld [vmem:[#allocation7 + $0x160] ss:$8 sps:$4 sm:$0xff]   ;;  %v332_v22 = vld [vmem:[%s3575_s21 + $0x10] sm:$0xff]  ;;  %s2444_s14 = sshll.u32 %s326_s12, 4  ;;  %s3896_s14 = int_to_ptr.vmem [resolvable:$true] %s2444_s14 }
  0x72   : > { %vm3588_vm10 = vmor %vm407_vm7, %vm404_vm3  ;;  %v330_v20 = vld [vmem:[%s3575_s21] sm:$0xff]  ;;  %v331_v21 = vld [vmem:[%s3575_s21 + $0x8] sm:$0xff]  ;;  %vm446_vm4 = vsmask.f32 4368  ;;  %s2795_s18 = sshll.u32 %s3418_s28, 10  ;;  %s2430_s28 = scalar_lea.sflag [#allocation6], %s3569_s23 }
  0x73   : > { %vm3596_vm11 = vmor %vm418_vm9, %vm416_vm8  ;;  %v333_v23 = vld [vmem:[%s3575_s21 + $0x18] sm:$0xff]  ;;  %v338_v24 = vld [vmem:[%s3946_s1] sm:$0x3]  ;;  %vm546_vm9 = vsmask.f32 7440  ;;  %s3901_s9 = scalar_lea.hbm %s3952_s7, %s2795_s18  ;;  %p3978_p0 = scmp.ne.s32.totalorder %s3961_s16, 0 }
  0x74   : > { %810 = vmatpush1.bf16.msra.mxu0 %v2909_v5  ;;  %v3608_v25 = vrot.slane %v338_v24, %v3592_v15  ;;  %v3611_v26 = vrot.slane %v338_v24, %v3594_v16  ;;  %v358_v27 = vld [vmem:[%s3947_s2] sm:$0x3]  ;;  %v420_v29 = vld [vmem:[#allocation2 + $0x10] sm:$0x11]  ;;  %v2925_v44 = vld [vmem:[#allocation7 + $0x184] ss:$8 sps:$4 sm:$0xff]  }
  0x75   : > { %811 = vmatprep.subr.bf16.mxu0 %v2910_v6  ;;  %v409_v28 = vld [vmem:[#allocation2] sm:$0x11]  ;;  %v2922_v30 = vld [vmem:[#allocation7 + $0x174] ss:$8 sps:$4 sm:$0xff]   ;;  %v3617_v31 = vrot.slane %v358_v27, %v3592_v15  ;;  %v3620_v32 = vrot.slane %v358_v27, %v3594_v16  ;;  %v421_v34 = vsel %vm3596_vm11, 0, %v420_v29  ;;  %vm489_vm3 = vmand %vm488_vm12, %vm415_vm5  ;;  %s3354_s20 = smov [#allocation10]  }
  0x76   : > { %v410_v33 = vsel %vm3588_vm10, 0, %v409_v28  ;;  %v350_v35 = vmul.f32 %v3608_v25, %v330_v20  ;;  %v351_v36 = vmul.f32 %v3611_v26, %v331_v21  ;;  %v352_v37 = vmul.f32 %v3608_v25, %v332_v22  ;;  %422 = vst [vmem:[#allocation2 + $0x10] sm:$0x11] %v421_v34  ;;  %v2924_v39 = vld [vmem:[#allocation7 + $0x170] ss:$8 sps:$4 sm:$0xff]   ;;  %vm491_vm7 = vmand %vm490_vm2, %vm417_vm6  ;;  %s3279_s11 = sshll.u32 %s3354_s20, 4  ;;  %s3280_s11 = int_to_ptr.vmem [resolvable:$false] %s3279_s11 }
  0x77   : > { %v353_v38 = vmul.f32 %v3611_v26, %v333_v23  ;;  %411 = vst [vmem:[#allocation2] sm:$0x11] %v410_v33  ;;  %v2927_v48 = vld [vmem:[#allocation7 + $0x180] ss:$8 sps:$4 sm:$0xff]   ;;  %v2928_v50 = vld [vmem:[#allocation7 + $0x194] ss:$8 sps:$4 sm:$0xff]   ;;  %vm3637_vm8 = vmor %vm491_vm7, %vm489_vm3  ;;  %p3282_p7 = scmp.lt.s32.totalorder %s3896_s14, %s3280_s11 }
  0x78   : > { %812 = vmatpush1.bf16.msra.mxu0 %v2912_v7  ;;  %v370_v40 = vadd.f32 %v3617_v31, %v350_v35  ;;  %v371_v41 = vadd.f32 %v3620_v32, %v351_v36  ;;  %v372_v42 = vadd.f32 %v3617_v31, %v352_v37  ;;  %v2930_v56 = vld [vmem:[#allocation7 + $0x190] ss:$8 sps:$4 sm:$0xff]   ;;  %v2931_v60 = vld [vmem:[#allocation7 + $0x1a4] ss:$8 sps:$4 sm:$0xff]   ;;  %v2933_v63 = vld [vmem:[#allocation7 + $0x1a0] ss:$8 sps:$4 sm:$0xff]  }
  0x79   : > { %813 = vmatprep.subr.bf16.mxu0 %v2913_v9  ;;  %v373_v43 = vadd.f32 %v3620_v32, %v353_v38  ;;  %vm3642_vm5 = vmor %vm403_vm0, %vm446_vm4  ;;  %v2934_v8 = vld [vmem:[#allocation7 + $0x1b4] ss:$8 sps:$4 sm:$0xff]   ;;  %vm545_vm6 = vsmask.f32 3328  ;;  %v2936_v20 = vld [vmem:[#allocation7 + $0x1b0] ss:$8 sps:$4 sm:$0xff]  }
  0x7a   : > { %vm378_vm13 = vcmp.gt.f32.partialorder %v370_v40, 0.0  ;;  %vm379_vm14 = vcmp.gt.f32.partialorder %v371_v41, 0.0  ;;  %vm380_vm15 = vcmp.gt.f32.partialorder %v372_v42, 0.0  ;;  %v386_v45 = vmul.f32 0.1, %v370_v40  ;;  %vm3665_vm0 = vmor %vm545_vm6, %vm546_vm9  ;;  %v334_v38 = vld [vmem:[%s3575_s21 + $0x20] sm:$0xff] }
  0x7b   : > { %vm381_vm1 = vcmp.gt.f32.partialorder %v373_v43, 0.0  ;;  %v387_v46 = vmul.f32 0.1, %v371_v41  ;;  %v388_v47 = vmul.f32 0.1, %v372_v42  ;;  %vm1098_vm2 = vcmask 1046532  }
  0x7c   : > { %814 = vmatpush1.bf16.msra.mxu0 %v2915_v10  ;;  %v389_v49 = vmul.f32 0.1, %v373_v43  ;;  %v394_v51 = vsel %vm378_vm13, %v370_v40, %v386_v45  ;;  %v2937_v24 = vld [vmem:[#allocation7 + $0x1c4] ss:$8 sps:$4 sm:$0xff]   ;;  %v2939_v29 = vld [vmem:[#allocation7 + $0x1c0] ss:$8 sps:$4 sm:$0xff]  }
  0x7d   : > { %815 = vmatprep.subr.bf16.mxu0 %v2916_v12  ;;  %v395_v52 = vsel %vm379_vm14, %v371_v41, %v387_v46  ;;  %v396_v53 = vsel %vm380_vm15, %v372_v42, %v388_v47  ;;  %v497_v7 = vld [vmem:[#allocation2 + $0x10] sm:$0x11]  ;;  %v337_v42 = vld [vmem:[%s3575_s21 + $0x38] sm:$0xff]  ;;  %v1384_v17 = vld [vmem:[%s3949_s4] sm:$0x3]  ;;  %s3281_s22 = scalar_lea.vmem %s3280_s11, 2048 }
  0x7e   : > { %v397_v54 = vsel %vm381_vm1, %v373_v43, %v389_v49  ;;  %v2786_v55 = vpack.c.bf16 %v395_v52, %v394_v51  ;;  %v493_v3 = vld [vmem:[#allocation2] sm:$0xff]  ;;  %v2940_v34 = vld [vmem:[#allocation7 + $0x1d4] ss:$8 sps:$4 sm:$0xff]   ;;  %v354_v43 = vmul.f32 %v3608_v25, %v334_v38  ;;  %v2942_v46 = vld [vmem:[#allocation7 + $0x1d0] ss:$8 sps:$4 sm:$0xff]   ;;  %vm1097_vm1 = vcmask 1042432  }
  0x7f   : > { %v2787_v57 = vpack.c.bf16 %v397_v54, %v396_v53  ;;  %v336_v41 = vld [vmem:[%s3575_s21 + $0x30] sm:$0xff]  ;;  %v412_v45 = vld [vmem:[#allocation2 + $0x18] sm:$0x11]  ;;  %vm3702_vm3 = vmor %vm1097_vm1, %vm1098_vm2 }
  0x80   : > { %816 = vmatpush1.bf16.msra.mxu0 %v2918_v14  ;;  %v449_v58 = vshrl.u32 %v2786_v55, 16  ;;  %v452_v59 = vshll.u32 %v2786_v55, 16  ;;  %v356_v47 = vmul.f32 %v3608_v25, %v336_v41  ;;  %v413_v49 = vsel %vm3588_vm10, 0, %v412_v45  ;;  %v2954_v41 = vld [vmem:[#allocation7 + $0x14] ss:$8 sps:$4 sm:$0xff]  }
  0x81   : > { %817 = vmatprep.subr.bf16.mxu0 %v2919_v18  ;;  %v457_v61 = vshrl.u32 %v2787_v57, 16  ;;  %v460_v62 = vshll.u32 %v2787_v57, 16  ;;  %v374_v53 = vadd.f32 %v3617_v31, %v354_v43  ;;  %414 = vst [vmem:[#allocation2 + $0x18] sm:$0x11] %v413_v49  ;;  %v3108_v36 = vld [vmem:[#allocation9 + $0x50] ss:$8 sps:$4 sm:$0xff]  }
  0x82   : > { %v451_v0 = vrot.slane %v449_v58, 7  ;;  %v376_v57 = vadd.f32 %v3617_v31, %v356_v47 }
  0x83   : > { %v459_v1 = vrot.slane %v457_v61, 7  ;;  %vm382_vm12 = vcmp.gt.f32.partialorder %v374_v53, 0.0 }
  0x84   : > { %818 = vmatpush1.bf16.msra.mxu0 %v2921_v19  ;;  %v454_v5 = vor.u32 %v452_v59, %v451_v0  ;;  %v455_v6 = vrot.slane %v451_v0, 4  ;;  %v390_v59 = vmul.f32 0.1, %v374_v53  ;;  %vm384_vm14 = vcmp.gt.f32.partialorder %v376_v57, 0.0 }
  0x85   : > { %819 = vmatprep.subr.bf16.mxu0 %v2922_v30  ;;  %v462_v9 = vor.u32 %v460_v62, %v459_v1  ;;  %v464_v10 = vrot.slane %v459_v1, 4  ;;  %v392_v62 = vmul.f32 0.1, %v376_v57 }
  0x86   : > { %v3648_v11 = vsel %vm3637_vm8, %v454_v5, %v493_v3  ;;  %v398_v0 = vsel %vm382_vm12, %v374_v53, %v390_v59  ;;  %v2945_v3 = vld [vmem:[#allocation7 + $0x1e0] ss:$8 sps:$4 sm:$0xff]   ;;  %v2957_v53 = vld [vmem:[#allocation7 + $0x24] ss:$8 sps:$4 sm:$0xff]  }
  0x87   : > { %v3652_v12 = vsel %vm3642_vm5, %v455_v6, %v462_v9  ;;  %495 = vst [vmem:[#allocation2] sm:$0xff] %v3648_v11  ;;  %v498_v14 = vsel %vm3588_vm10, %v464_v10, %v497_v7  ;;  %v549_v18 = vshrl.u32 %v3648_v11, 16  ;;  %v552_v19 = vshll.u32 %v3648_v11, 16  ;;  %v2946_v6 = vld [vmem:[#allocation7 + $0x1f4] ss:$8 sps:$4 sm:$0xff]  }
  0x88   : > { %820 = vmatpush1.bf16.msra.mxu0 %v2924_v39  ;;  %499 = vst [vmem:[#allocation2 + $0x10] sm:$0x11] %v498_v14  ;;  %v558_v21 = vshll.u32 %v3652_v12, 16  ;;  %v562_v22 = vshrl.u32 %v3652_v12, 16  ;;  %v2590_v23 = vcombine.low %v3648_v11, %v3652_v12  ;;  %v335_v39 = vld [vmem:[%s3575_s21 + $0x28] sm:$0xff]  ;;  %v400_v5 = vsel %vm384_vm14, %v376_v57, %v392_v62 }
  0x89   : > { %821 = vmatprep.subr.bf16.mxu0 %v2925_v44  ;;  %v551_v27 = vrot.slane %v549_v18, 4  ;;  %v554_v28 = vrot.slane %v552_v19, 5  ;;  %v355_v44 = vmul.f32 %v3611_v26, %v335_v39  ;;  %v2948_v18 = vld [vmem:[#allocation7 + $0x1f0] ss:$8 sps:$4 sm:$0xff]   ;;  %v2955_v59 = vld [vmem:[#allocation7 + $0x20] ss:$8 sps:$4 sm:$0xff]  }
  0x8a   : > { %v560_v30 = vrot.slane %v558_v21, 5  ;;  %v564_v33 = vrot.slane %v562_v22, 4  ;;  %v2951_v22 = vld [vmem:[#allocation7 + $0x4] ss:$8 sps:$4 sm:$0xff]  }
  0x8b   : > { %v555_v35 = vor.u32 %v554_v28, %v551_v27  ;;  %v375_v54 = vadd.f32 %v3620_v32, %v355_v44  ;;  %v3102_v44 = vld [vmem:[#allocation9 + $0x30] ss:$8 sps:$4 sm:$0xff]  }
  0x8c   : > { %822 = vmatpush1.bf16.msra.mxu0 %v2927_v48  ;;  %v565_v37 = vor.u32 %v564_v33, %v560_v30  ;;  %v357_v48 = vmul.f32 %v3611_v26, %v337_v42 }
  0x8d   : > { %823 = vmatprep.subr.bf16.mxu0 %v2928_v50  ;;  %v556_v40 = vrot.slane %v555_v35, 4  ;;  %v423_v50 = vld [vmem:[#allocation2 + $0x28] sm:$0x11]  ;;  %vm383_vm13 = vcmp.gt.f32.partialorder %v375_v54, 0.0 }
  0x8e   : > { %v566_v52 = vrot.slane %v565_v37, 4  ;;  %v424_v55 = vsel %vm3596_vm11, 0, %v423_v50  ;;  %v377_v58 = vadd.f32 %v3620_v32, %v357_v48  ;;  %v2949_v37 = vld [vmem:[#allocation7] ss:$8 sps:$4 sm:$0xff]   ;;  %v2952_v48 = vld [vmem:[#allocation7 + $0x10] ss:$8 sps:$4 sm:$0xff]  }
  0x8f   : > { %v3679_v51 = vld [vmem:[#allocation2 + $0x10] sm:$0x11]  ;;  %v561_v25 = vsel %vm3665_vm0, %v556_v40, %v560_v30  ;;  %425 = vst [vmem:[#allocation2 + $0x28] sm:$0x11] %v424_v55 }
  0x90   : > { %824 = vmatpush1.bf16.msra.mxu0 %v2930_v56  ;;  %v2943_v56 = vld [vmem:[#allocation7 + $0x1e4] ss:$8 sps:$4 sm:$0xff]   ;;  %v568_v26 = vshll.u32 %v3679_v51, 16  ;;  %vm385_vm15 = vcmp.gt.f32.partialorder %v377_v58, 0.0  ;;  %v1105_v35 = vrot.slane %v3679_v51, 5 }
  0x91   : > { %825 = vmatprep.subr.bf16.mxu0 %v2931_v60  ;;  %v391_v60 = vmul.f32 0.1, %v375_v54 }
  0x92   : > { %v570_v61 = vrot.slane %v568_v26, 5 }
  0x93   : > { %v399_v1 = vsel %vm383_vm13, %v375_v54, %v391_v60  ;;  %v2960_v60 = vld [vmem:[#allocation7 + $0x34] ss:$8 sps:$4 sm:$0xff]  }
  0x94   : > { %826 = vmatpush1.bf16.msra.mxu0 %v2933_v63  ;;  %v393_v63 = vmul.f32 0.1, %v377_v58  ;;  %v571_v31 = vsel %vm3665_vm0, %v566_v52, %v570_v61  ;;  %v2788_v32 = vpack.c.bf16 %v399_v1, %v398_v0 }
  0x95   : > { %827 = vmatprep.subr.bf16.mxu0 %v2934_v8  ;;  %v2555_v7 = vcombine.high %v561_v25, %v571_v31  ;;  %v2554_v30 = vcombine.low %v561_v25, %v571_v31  ;;  %v2958_v31 = vld [vmem:[#allocation7 + $0x30] ss:$8 sps:$4 sm:$0xff]  }
  0x96   : > { %v401_v8 = vsel %vm385_vm15, %v377_v58, %v393_v63  ;;  %v466_v10 = vshrl.u32 %v2788_v32, 16  ;;  %v469_v14 = vshll.u32 %v2788_v32, 16  ;;  %v504_v33 = vld [vmem:[#allocation2 + $0x28] sm:$0x11] }
  0x97   : > { %v2789_v9 = vpack.c.bf16 %v401_v8, %v400_v5  ;;  %837 = vmatprep.mubr.bf16.mxu0 %v2555_v7  ;;  %v2963_v5 = vld [vmem:[#allocation7 + $0x44] ss:$8 sps:$4 sm:$0xff]   ;;  %v2961_v8 = vld [vmem:[#allocation7 + $0x40] ss:$8 sps:$4 sm:$0xff]  }
  0x98   : > { %828 = vmatpush1.bf16.msra.mxu0 %v2936_v20  ;;  %v468_v19 = vrot.slane %v466_v10, 7  ;;  %v2591_v10 = vcombine.high %v3648_v11, %v3652_v12  ;;  %v3011_v11 = vld [vmem:[#allocation7 + $0x244] ss:$8 sps:$4 sm:$0xff]  }
  0x99   : > { %829 = vmatprep.subr.bf16.mxu0 %v2937_v24  ;;  %v474_v20 = vshrl.u32 %v2789_v9, 16  ;;  %v477_v21 = vshll.u32 %v2789_v9, 16  ;;  %v500_v24 = vld [vmem:[#allocation2 + $0x18] sm:$0xff] }
  0x9a   : > { %v471_v27 = vor.u32 %v469_v14, %v468_v19  ;;  %v472_v28 = vrot.slane %v468_v19, 4  ;;  %v1091_v14 = vld [vmem:[#allocation2] sm:$0xee] }
  0x9c   : > { %830 = vmatpush1.bf16.msra.mxu0 %v2939_v29  ;;  %v476_v29 = vrot.slane %v474_v20, 7  ;;  %v3696_v40 = vsel %vm3637_vm8, %v471_v27, %v500_v24  ;;  %v3045_v24 = vld [vmem:[#allocation9 + $0x104] ss:$8 sps:$4 sm:$0xff]   ;;  %v2966_v27 = vld [vmem:[#allocation7 + $0x54] ss:$8 sps:$4 sm:$0xff]  }
  0x9d   : > { %831 = vmatprep.subr.bf16.mxu0 %v2940_v34  ;;  %v1102_v34 = vrot.slane %v3652_v12, 5  ;;  %502 = vst [vmem:[#allocation2 + $0x18] sm:$0xff] %v3696_v40  ;;  %v573_v42 = vshrl.u32 %v3696_v40, 16  ;;  %v576_v43 = vshll.u32 %v3696_v40, 16  ;;  %1829 = vmatprep.subr.bf16.mxu1 %v3045_v24  ;;  %v3008_v24 = vld [vmem:[#allocation7 + $0x234] ss:$8 sps:$4 sm:$0xff]  }
  0x9e   : > { %v479_v38 = vor.u32 %v477_v21, %v476_v29  ;;  %v481_v39 = vrot.slane %v476_v29, 4  ;;  %v2626_v21 = vrot.slane %v1091_v14, 9  ;;  %v2997_v14 = vld [vmem:[#allocation7 + $0x200] ss:$8 sps:$4 sm:$0xff]  }
  0x9f   : > { %v1104_v47 = vrot.slane %v1102_v34, 4  ;;  %v575_v49 = vrot.slane %v573_v42, 4  ;;  %v578_v50 = vrot.slane %v576_v43, 5  ;;  %v3050_v42 = vld [vmem:[#allocation9 + $0x110] ss:$8 sps:$4 sm:$0xff]  }
  0xa0   : > { %832 = vmatpush1.bf16.msra.mxu0 %v2942_v46  ;;  %v3708_v45 = vsel %vm3642_vm5, %v472_v28, %v479_v38  ;;  %v505_v46 = vsel %vm3588_vm10, %v481_v39, %v504_v33  ;;  %v3047_v28 = vld [vmem:[#allocation9 + $0x100] ss:$8 sps:$4 sm:$0xff]   ;;  %v3737_v29 = vsel %vm3702_vm3, %v2626_v21, %v1102_v34  ;;  %v3048_v33 = vld [vmem:[#allocation9 + $0x114] ss:$8 sps:$4 sm:$0xff]   ;;  %v2964_v39 = vld [vmem:[#allocation7 + $0x50] ss:$8 sps:$4 sm:$0xff]  }
  0xa1   : > { %833 = vmatprep.subr.bf16.mxu0 %v2943_v56  ;;  %506 = vst [vmem:[#allocation2 + $0x28] sm:$0x11] %v505_v46  ;;  %v582_v51 = vshll.u32 %v3708_v45, 16  ;;  %v586_v52 = vshrl.u32 %v3708_v45, 16  ;;  %v2592_v54 = vcombine.low %v3696_v40, %v3708_v45  ;;  %v3720_v55 = vsel %vm3702_vm3, %v1104_v47, %v1105_v35  ;;  %1830 = vmatpush1.bf16.msra.mxu1 %v3047_v28  ;;  %v2967_v43 = vld [vmem:[#allocation7 + $0x60] ss:$8 sps:$4 sm:$0xff]  }
  0xa2   : > { %v579_v56 = vor.u32 %v578_v50, %v575_v49  ;;  %v1109_v57 = vrot.slane %v3708_v45, 5  ;;  %v2628_v35 = vcombine.low %v3737_v29, %v3720_v55  ;;  %1831 = vmatprep.subr.bf16.mxu1 %v3048_v33  ;;  %v3051_v46 = vld [vmem:[#allocation9 + $0x124] ss:$8 sps:$4 sm:$0xff]   ;;  %v2972_v47 = vld [vmem:[#allocation7 + $0x74] ss:$8 sps:$4 sm:$0xff]  }
  0xa3   : > { %v584_v25 = vrot.slane %v582_v51, 5  ;;  %v588_v26 = vrot.slane %v586_v52, 4  ;;  %v3054_v49 = vld [vmem:[#allocation9 + $0x134] ss:$8 sps:$4 sm:$0xff]   ;;  %v2970_v50 = vld [vmem:[#allocation7 + $0x70] ss:$8 sps:$4 sm:$0xff]  }
  0xa4   : > { %834 = vmatpush1.bf16.msra.mxu0 %v2945_v3  ;;  %v580_v61 = vrot.slane %v579_v56, 4  ;;  %v1111_v62 = vrot.slane %v1109_v57, 4  ;;  %v2975_v51 = vld [vmem:[#allocation7 + $0x84] ss:$8 sps:$4 sm:$0xff]   ;;  %v3056_v52 = vld [vmem:[#allocation9 + $0x130] ss:$8 sps:$4 sm:$0xff]  }
  0xa5   : > { %835 = vmatprep.subr.bf16.mxu0 %v2946_v6  ;;  %v589_v58 = vor.u32 %v588_v26, %v584_v25  ;;  %1832 = vmatpush1.bf16.msra.mxu1 %v3050_v42  ;;  %v2973_v56 = vld [vmem:[#allocation7 + $0x80] ss:$8 sps:$4 sm:$0xff]   ;;  %v3005_v21 = vld [vmem:[#allocation7 + $0x224] ss:$8 sps:$4 sm:$0xff]   ;;  %v3012_v28 = vld [vmem:[#allocation7 + $0x250] ss:$8 sps:$4 sm:$0xff]  }
  0xa6   : > { %v585_v32 = vsel %vm3665_vm0, %v580_v61, %v584_v25  ;;  %1833 = vmatprep.subr.bf16.mxu1 %v3051_v46  ;;  %v2978_v25 = vld [vmem:[#allocation7 + $0x94] ss:$8 sps:$4 sm:$0xff]   ;;  %v3059_v26 = vld [vmem:[#allocation9 + $0x140] ss:$8 sps:$4 sm:$0xff]   ;;  %v3063_v61 = vld [vmem:[#allocation9 + $0x164] ss:$8 sps:$4 sm:$0xff]  }
  0xa7   : > { %v590_v0 = vrot.slane %v589_v58, 4  ;;  %v2976_v58 = vld [vmem:[#allocation7 + $0x90] ss:$8 sps:$4 sm:$0xff]   ;;  %v3009_v12 = vld [vmem:[#allocation7 + $0x240] ss:$8 sps:$4 sm:$0xff]  }
  0xa8   : > { %836 = vmatpush1.bf16.msra.mxu0 %v2948_v18  ;;  %v544_v63 = vld [vmem:[#allocation2 + $0x28] sm:$0x11]  ;;  %v1092_v18 = vld [vmem:[#allocation2 + $0x18] sm:$0xee] }
  0xa9   : > { %1038 = vmatprep.subr.bf16.mxu0 %v2951_v22  ;;  %v592_v1 = vshll.u32 %v544_v63, 16  ;;  %v1112_v3 = vrot.slane %v544_v63, 5  ;;  %v2627_v22 = vrot.slane %v1092_v18, 9  ;;  %v2984_v63 = vld [vmem:[#allocation7 + $0xb4] ss:$8 sps:$4 sm:$0xff]   ;;  %v2593_v18 = vcombine.high %v3696_v40, %v3708_v45 }
  0xaa   : > { %v3017_v33 = vld [vmem:[#allocation7 + $0x264] ss:$8 sps:$4 sm:$0xff]   ;;  %v3020_v40 = vld [vmem:[#allocation7 + $0x274] ss:$8 sps:$4 sm:$0xff]   ;;  %v3018_v45 = vld [vmem:[#allocation7 + $0x270] ss:$8 sps:$4 sm:$0xff]  }
  0xab   : > { %838 = vmatmul.mubr.bf16.vlgmr.msra.gmra.mrb[0].mxu0 %v2554_v30  ;;  %v594_v6 = vrot.slane %v592_v1, 5  ;;  %v3727_v7 = vsel %vm3702_vm3, %v1111_v62, %v1112_v3  ;;  %v3741_v30 = vsel %vm3702_vm3, %v2627_v22, %v1109_v57  ;;  %v3060_v57 = vld [vmem:[#allocation9 + $0x154] ss:$8 sps:$4 sm:$0xff]   ;;  %v2979_v62 = vld [vmem:[#allocation7 + $0xa0] ss:$8 sps:$4 sm:$0xff]  }
  0xac   : > { %1039 = vmatpush1.bf16.msra.mxu0 %v2949_v37  ;;  %v2629_v37 = vcombine.high %v3737_v29, %v3720_v55  ;;  %v2631_v38 = vcombine.high %v3741_v30, %v3727_v7  ;;  %v2630_v34 = vcombine.low %v3741_v30, %v3727_v7  ;;  %v2987_v1 = vld [vmem:[#allocation7 + $0xc4] ss:$8 sps:$4 sm:$0xff]   ;;  %v2985_v3 = vld [vmem:[#allocation7 + $0xc0] ss:$8 sps:$4 sm:$0xff]   ;;  %v3024_v42 = vld [vmem:[#allocation7 + $0x290] ss:$8 sps:$4 sm:$0xff]  }
  0xad   : > { %1040 = vmatprep.subr.bf16.mxu0 %v2954_v41  ;;  %v595_v9 = vsel %vm3665_vm0, %v590_v0, %v594_v6  ;;  %v2969_v41 = vld [vmem:[#allocation7 + $0x64] ss:$8 sps:$4 sm:$0xff]   ;;  %v2982_v0 = vld [vmem:[#allocation7 + $0xb0] ss:$8 sps:$4 sm:$0xff]   ;;  %v2991_v6 = vld [vmem:[#allocation7 + $0xe0] ss:$8 sps:$4 sm:$0xff]  }
  0xae   : > { %v2557_v19 = vcombine.high %v585_v32, %v595_v9  ;;  %v2556_v20 = vcombine.low %v585_v32, %v595_v9  ;;  %v2993_v32 = vld [vmem:[#allocation7 + $0xe4] ss:$8 sps:$4 sm:$0xff]   ;;  %v2994_v9 = vld [vmem:[#allocation7 + $0xf0] ss:$8 sps:$4 sm:$0xff]   ;;  %v3003_v22 = vld [vmem:[#allocation7 + $0x220] ss:$8 sps:$4 sm:$0xff]  }
  0xaf   : > { %v3027_v46 = vld [vmem:[#allocation7 + $0x2a0] ss:$8 sps:$4 sm:$0xff]   ;;  %v1448_v55 = vld [vmem:[#allocation3] sm:$0x11]  ;;  %v3075_v30 = vld [vmem:[#allocation9 + $0x1a4] ss:$8 sps:$4 sm:$0xff]  }
  0xb0   : > { %1041 = vmatpush1.bf16.msra.mxu0 %v2952_v48  ;;  %847 = vmatprep.mubr.bf16.mxu0 %v2557_v19  ;;  %v3053_v48 = vld [vmem:[#allocation9 + $0x120] ss:$8 sps:$4 sm:$0xff]   ;;  %v3002_v19 = vld [vmem:[#allocation7 + $0x214] ss:$8 sps:$4 sm:$0xff]  }
  0xb1   : > { %1042 = vmatprep.subr.bf16.mxu0 %v2957_v53  ;;  %v3057_v53 = vld [vmem:[#allocation9 + $0x144] ss:$8 sps:$4 sm:$0xff]   ;;  %1834 = vmatpush1.bf16.msra.mxu1 %v3053_v48  ;;  %v3030_v48 = vld [vmem:[#allocation7 + $0x2b0] ss:$8 sps:$4 sm:$0xff]   ;;  %v3072_v29 = vld [vmem:[#allocation9 + $0x194] ss:$8 sps:$4 sm:$0xff]  }
  0xb2   : > { %1835 = vmatprep.subr.bf16.mxu1 %v3054_v49  ;;  %v3035_v49 = vld [vmem:[#allocation7 + $0x2c4] ss:$8 sps:$4 sm:$0xff]  }
  0xb3   : > { %848 = vmatmul.mubr.bf16.gmra.mrb[4].mxu0 %v2556_v20  ;;  %v3000_v20 = vld [vmem:[#allocation7 + $0x210] ss:$8 sps:$4 sm:$0xff]  }
  0xb4   : > { %1043 = vmatpush1.bf16.msra.mxu0 %v2955_v59  ;;  %1070 = vmatprep.mubr.bf16.mxu0 %v2591_v10  ;;  %v2981_v59 = vld [vmem:[#allocation7 + $0xa4] ss:$8 sps:$4 sm:$0xff]  }
  0xb5   : > { %1044 = vmatprep.subr.bf16.mxu0 %v2960_v60  ;;  %1836 = vmatpush1.bf16.msra.mxu1 %v3056_v52  ;;  %v3062_v60 = vld [vmem:[#allocation9 + $0x150] ss:$8 sps:$4 sm:$0xff]   ;;  %v2999_v10 = vld [vmem:[#allocation7 + $0x204] ss:$8 sps:$4 sm:$0xff]  }
  0xb6   : > { %1837 = vmatprep.subr.bf16.mxu1 %v3057_v53  ;;  %v3036_v52 = vld [vmem:[#allocation7 + $0x2d0] ss:$8 sps:$4 sm:$0xff]   ;;  %v3041_v53 = vld [vmem:[#allocation7 + $0x2e4] ss:$8 sps:$4 sm:$0xff]  }
  0xb8   : > { %1045 = vmatpush1.bf16.msra.mxu0 %v2958_v31  ;;  %v2990_v31 = vld [vmem:[#allocation7 + $0xd4] ss:$8 sps:$4 sm:$0xff]  }
  0xb9   : > { %1046 = vmatprep.subr.bf16.mxu0 %v2963_v5  ;;  %1838 = vmatpush1.bf16.msra.mxu1 %v3059_v26  ;;  %v2988_v5 = vld [vmem:[#allocation7 + $0xd0] ss:$8 sps:$4 sm:$0xff]  }
  0xba   : > { %1839 = vmatprep.subr.bf16.mxu1 %v3060_v57  ;;  %v3042_v26 = vld [vmem:[#allocation7 + $0x2f0] ss:$8 sps:$4 sm:$0xff]   ;;  %v3065_v57 = vld [vmem:[#allocation9 + $0x160] ss:$8 sps:$4 sm:$0xff]  }
  0xbc   : > { %1047 = vmatpush1.bf16.msra.mxu0 %v2961_v8  ;;  %v2996_v8 = vld [vmem:[#allocation7 + $0xf4] ss:$8 sps:$4 sm:$0xff]  }
  0xbd   : > { %1048 = vmatprep.subr.bf16.mxu0 %v2966_v27  ;;  %1840 = vmatpush1.bf16.msra.mxu1 %v3062_v60  ;;  %v3006_v27 = vld [vmem:[#allocation7 + $0x230] ss:$8 sps:$4 sm:$0xff]   ;;  %v3069_v60 = vld [vmem:[#allocation9 + $0x184] ss:$8 sps:$4 sm:$0xff]  }
  0xbe   : > { %1841 = vmatprep.subr.bf16.mxu1 %v3063_v61  ;;  %v3071_v61 = vld [vmem:[#allocation9 + $0x180] ss:$8 sps:$4 sm:$0xff]  }
  0xc0   : > { %1049 = vmatpush1.bf16.msra.mxu0 %v2964_v39  ;;  %v3015_v39 = vld [vmem:[#allocation7 + $0x260] ss:$8 sps:$4 sm:$0xff]  }
  0xc1   : > { %1050 = vmatprep.subr.bf16.mxu0 %v2969_v41  ;;  %v3026_v41 = vld [vmem:[#allocation7 + $0x294] ss:$8 sps:$4 sm:$0xff]   ;;  %1842 = vmatpush1.bf16.msra.mxu1 %v3065_v57 }
  0xc4   : > { %1051 = vmatpush1.bf16.msra.mxu0 %v2967_v43  ;;  %v3029_v43 = vld [vmem:[#allocation7 + $0x2a4] ss:$8 sps:$4 sm:$0xff]  }
  0xc5   : > { %1052 = vmatprep.subr.bf16.mxu0 %v2972_v47  ;;  %v3032_v47 = vld [vmem:[#allocation7 + $0x2b4] ss:$8 sps:$4 sm:$0xff]  }
  0xc8   : > { %1053 = vmatpush1.bf16.msra.mxu0 %v2970_v50  ;;  %v3033_v50 = vld [vmem:[#allocation7 + $0x2c0] ss:$8 sps:$4 sm:$0xff]  }
  0xc9   : > { %1054 = vmatprep.subr.bf16.mxu0 %v2975_v51  ;;  %v3038_v51 = vld [vmem:[#allocation7 + $0x2d4] ss:$8 sps:$4 sm:$0xff]  }
  0xcc   : > { %1055 = vmatpush1.bf16.msra.mxu0 %v2973_v56  ;;  %v3039_v56 = vld [vmem:[#allocation7 + $0x2e0] ss:$8 sps:$4 sm:$0xff]  }
  0xcd   : > { %1056 = vmatprep.subr.bf16.mxu0 %v2978_v25  ;;  %v3044_v25 = vld [vmem:[#allocation7 + $0x2f4] ss:$8 sps:$4 sm:$0xff]  }
  0xd0   : > { %1057 = vmatpush1.bf16.msra.mxu0 %v2976_v58  ;;  %v3066_v58 = vld [vmem:[#allocation9 + $0x174] ss:$8 sps:$4 sm:$0xff]  }
  0xd1   : > { %1058 = vmatprep.subr.bf16.mxu0 %v2981_v59  ;;  %v3068_v59 = vld [vmem:[#allocation9 + $0x170] ss:$8 sps:$4 sm:$0xff]   ;;  %1843 = vmatprep.subr.bf16.mxu1 %v3066_v58 }
  0xd2   : > { %1844 = vmatpush1.bf16.msra.mxu1 %v3068_v59 }
  0xd3   : > { %1845 = vmatprep.subr.bf16.mxu1 %v3069_v60 }
  0xd4   : > { %1059 = vmatpush1.bf16.msra.mxu0 %v2979_v62  ;;  %v1454_v62 = vld [vmem:[#allocation3 + $0x10] sm:$0x11] }
  0xd5   : > { %1060 = vmatprep.subr.bf16.mxu0 %v2984_v63  ;;  %v1455_v7 = vsel %vm3596_vm11, 0, %v1454_v62  ;;  %v3078_v63 = vld [vmem:[#allocation9 + $0x1b4] ss:$8 sps:$4 sm:$0xff]  }
  0xd6   : > { %1846 = vmatpush1.bf16.msra.mxu1 %v3071_v61  ;;  %1456 = vst [vmem:[#allocation3 + $0x10] sm:$0x11] %v1455_v7 }
  0xd7   : > { %1847 = vmatprep.subr.bf16.mxu1 %v3072_v29 }
  0xd8   : > { %1061 = vmatpush1.bf16.msra.mxu0 %v2982_v0  ;;  %v1451_v0 = vld [vmem:[#allocation3 + $0x18] sm:$0x11] }
  0xd9   : > { %1062 = vmatprep.subr.bf16.mxu0 %v2987_v1  ;;  %v3080_v1 = vld [vmem:[#allocation9 + $0x1b0] ss:$8 sps:$4 sm:$0xff]  }
  0xdc   : > { %1063 = vmatpush1.bf16.msra.mxu0 %v2985_v3  ;;  %v1452_v3 = vsel %vm3588_vm10, 0, %v1451_v0 }
  0xdd   : > { %1064 = vmatprep.subr.bf16.mxu0 %v2990_v31  ;;  %1453 = vst [vmem:[#allocation3 + $0x18] sm:$0x11] %v1452_v3  ;;  %v1457_v31 = vld [vmem:[#allocation3 + $0x28] sm:$0x11] }
  0xe0   : > { %1065 = vmatpush1.bf16.msra.mxu0 %v2988_v5  ;;  %v3081_v5 = vld [vmem:[#allocation9 + $0x1c4] ss:$8 sps:$4 sm:$0xff]  }
  0xe1   : > { %1066 = vmatprep.subr.bf16.mxu0 %v2993_v32  ;;  %v1458_v32 = vsel %vm3596_vm11, 0, %v1457_v31 }
  0xe2   : > { %1459 = vst [vmem:[#allocation3 + $0x28] sm:$0x11] %v1458_v32 }
  0xe4   : > { %1067 = vmatpush1.bf16.msra.mxu0 %v2991_v6  ;;  %v3083_v6 = vld [vmem:[#allocation9 + $0x1c0] ss:$8 sps:$4 sm:$0xff]  }
  0xe5   : > { %1068 = vmatprep.subr.bf16.mxu0 %v2996_v8  ;;  %v3084_v8 = vld [vmem:[#allocation9 + $0x1d4] ss:$8 sps:$4 sm:$0xff]  }
  0xe8   : > { %1069 = vmatpush1.bf16.msra.mxu0 %v2994_v9  ;;  %v3086_v9 = vld [vmem:[#allocation9 + $0x1d0] ss:$8 sps:$4 sm:$0xff]  }
  0xe9   : > { %1323 = vmatprep.subr.bf16.mxu0 %v2999_v10  ;;  %v3087_v10 = vld [vmem:[#allocation9 + $0x1e4] ss:$8 sps:$4 sm:$0xff]  }
  0xeb   : > { %1071 = vmatmul.mubr.bf16.vlgmr.msra.gmra.mrb[0].mxu0 %v2590_v23  ;;  %v3014_v23 = vld [vmem:[#allocation7 + $0x254] ss:$8 sps:$4 sm:$0xff]  }
  0xec   : > { %1324 = vmatpush1.bf16.msra.mxu0 %v2997_v14  ;;  %1080 = vmatprep.mubr.bf16.mxu0 %v2593_v18  ;;  %v3089_v14 = vld [vmem:[#allocation9 + $0x1e0] ss:$8 sps:$4 sm:$0xff]   ;;  %v3090_v18 = vld [vmem:[#allocation9 + $0x1f4] ss:$8 sps:$4 sm:$0xff]  }
  0xed   : > { %1325 = vmatprep.subr.bf16.mxu0 %v3002_v19  ;;  %v3092_v19 = vld [vmem:[#allocation9 + $0x1f0] ss:$8 sps:$4 sm:$0xff]  }
  0xf0   : > { %1326 = vmatpush1.bf16.msra.mxu0 %v3000_v20  ;;  %v3095_v20 = vld [vmem:[#allocation9 + $0x4] ss:$8 sps:$4 sm:$0xff]  }
  0xf1   : > { %1327 = vmatprep.subr.bf16.mxu0 %v3005_v21  ;;  %v1404_v21 = vld [vmem:[%s3950_s5] sm:$0x3] }
  0xf3   : > { %1081 = vmatmul.mubr.bf16.gmra.mrb[4].mxu0 %v2592_v54  ;;  %v3023_v54 = vld [vmem:[#allocation7 + $0x284] ss:$8 sps:$4 sm:$0xff]  }
  0xf4   : > { %1328 = vmatpush1.bf16.msra.mxu0 %v3003_v22  ;;  %1355 = vmatprep.mubr.bf16.mxu0 %v2629_v37  ;;  %v3021_v37 = vld [vmem:[#allocation7 + $0x280] ss:$8 sps:$4 sm:$0xff]   ;;  %v1389_v22 = vrot.slane %v1384_v17, %v3592_v15 }
  0xf5   : > { %1329 = vmatprep.subr.bf16.mxu0 %v3008_v24  ;;  %v1393_v24 = vrot.slane %v1384_v17, %v3594_v16 }
  0xf8   : > { %1330 = vmatpush1.bf16.msra.mxu0 %v3006_v27  ;;  %v1409_v27 = vrot.slane %v1404_v21, %v3592_v15 }
  0xf9   : > { %1331 = vmatprep.subr.bf16.mxu0 %v3011_v11 }
  0xfc   : > { %1332 = vmatpush1.bf16.msra.mxu0 %v3009_v12  ;;  %v1413_v12 = vrot.slane %v1404_v21, %v3594_v16 }
  0xfd   : > { %1333 = vmatprep.subr.bf16.mxu0 %v3014_v23 }
 0x100   : > { %1334 = vmatpush1.bf16.msra.mxu0 %v3012_v28 }
 0x101   : > { %1335 = vmatprep.subr.bf16.mxu0 %v3017_v33 }
 0x104   : > { %1336 = vmatpush1.bf16.msra.mxu0 %v3015_v39 }
 0x105   : > { %1337 = vmatprep.subr.bf16.mxu0 %v3020_v40 }
 0x108   : > { %1338 = vmatpush1.bf16.msra.mxu0 %v3018_v45 }
 0x109   : > { %1339 = vmatprep.subr.bf16.mxu0 %v3023_v54 }
 0x10c   : > { %1340 = vmatpush1.bf16.msra.mxu0 %v3021_v37 }
 0x10d   : > { %1341 = vmatprep.subr.bf16.mxu0 %v3026_v41 }
 0x110   : > { %1342 = vmatpush1.bf16.msra.mxu0 %v3024_v42 }
 0x111   : > { %1343 = vmatprep.subr.bf16.mxu0 %v3029_v43 }
 0x114   : > { %1344 = vmatpush1.bf16.msra.mxu0 %v3027_v46 }
 0x115   : > { %1345 = vmatprep.subr.bf16.mxu0 %v3032_v47 }
 0x118   : > { %1346 = vmatpush1.bf16.msra.mxu0 %v3030_v48 }
 0x119   : > { %1347 = vmatprep.subr.bf16.mxu0 %v3035_v49 }
 0x11c   : > { %1348 = vmatpush1.bf16.msra.mxu0 %v3033_v50 }
 0x11d   : > { %1349 = vmatprep.subr.bf16.mxu0 %v3038_v51 }
 0x120   : > { %1350 = vmatpush1.bf16.msra.mxu0 %v3036_v52 }
 0x121   : > { %1351 = vmatprep.subr.bf16.mxu0 %v3041_v53 }
 0x124   : > { %1352 = vmatpush1.bf16.msra.mxu0 %v3039_v56 }
 0x125   : > { %1353 = vmatprep.subr.bf16.mxu0 %v3044_v25 }
 0x128   : > { %1354 = vmatpush1.bf16.msra.mxu0 %v3042_v26 }
 0x12b   : > { %1356 = vmatmul.mubr.bf16.vlgmr.msra.gmra.mrb[0].mxu0 %v2628_v35  ;;  %v1449_v35 = vsel %vm3588_vm10, 0, %v1448_v55 }
 0x12c   : > { %1365 = vmatprep.mubr.bf16.mxu0 %v2631_v38  ;;  %v3074_v38 = vld [vmem:[#allocation9 + $0x190] ss:$8 sps:$4 sm:$0xff]   ;;  %1450 = vst [vmem:[#allocation3] sm:$0x11] %v1449_v35 }
 0x12d   : > { %1848 = vmatpush1.bf16.msra.mxu1 %v3074_v38 }
 0x12e   : > { %1849 = vmatprep.subr.bf16.mxu1 %v3075_v30 }
 0x133   : > { %1366 = vmatmul.mubr.bf16.gmra.mrb[4].mxu0 %v2630_v34  ;;  %v3077_v34 = vld [vmem:[#allocation9 + $0x1a0] ss:$8 sps:$4 sm:$0xff]  }
 0x134   : > { %1850 = vmatpush1.bf16.msra.mxu1 %v3077_v34  ;;  %v1520_v34 = vld [vmem:[#allocation3] sm:$0xff] }
 0x135   : > { %1851 = vmatprep.subr.bf16.mxu1 %v3078_v63 }
 0x138   : > { %1852 = vmatpush1.bf16.msra.mxu1 %v3080_v1 }
 0x139   : > { %1853 = vmatprep.subr.bf16.mxu1 %v3081_v5 }
 0x13c   : > { %1854 = vmatpush1.bf16.msra.mxu1 %v3083_v6  ;;  %v1524_v6 = vld [vmem:[#allocation3 + $0x10] sm:$0x11] }
 0x13d   : > { %1855 = vmatprep.subr.bf16.mxu1 %v3084_v8 }
 0x140   : > { %1856 = vmatpush1.bf16.msra.mxu1 %v3086_v9 }
 0x141   : > { %1857 = vmatprep.subr.bf16.mxu1 %v3087_v10 }
 0x144   : > { %1858 = vmatpush1.bf16.msra.mxu1 %v3089_v14 }
 0x145   : > { %1859 = vmatprep.subr.bf16.mxu1 %v3090_v18 }
 0x148   : > { %1860 = vmatpush1.bf16.msra.mxu1 %v3092_v19 }
 0x149   : > { %2062 = vmatprep.subr.bf16.mxu1 %v3095_v20 }
 0x1fe   : > { %v1357_v11 = vpop.f32.mrb[0].mxu0 }
 0x1ff   : > { %v1396_v23 = vmul.f32 %v1389_v22, %v1357_v11  ;;  %v1359_v28 = vpop.f32.mrb[1].mxu0 }
 0x200   : > { %v1397_v33 = vmul.f32 %v1393_v24, %v1359_v28  ;;  %v1361_v39 = vpop.f32.mrb[2].mxu0 }
 0x201   : > { %v1416_v40 = vadd.f32 %v1409_v27, %v1396_v23  ;;  %v1398_v45 = vmul.f32 %v1389_v22, %v1361_v39  ;;  %v1363_v54 = vpop.f32.mrb[3].mxu0 }
 0x202   : > { %v1417_v37 = vadd.f32 %v1413_v12, %v1397_v33  ;;  %v1399_v41 = vmul.f32 %v1393_v24, %v1363_v54 }
 0x203   : > { %vm1424_vm11 = vcmp.gt.f32.partialorder %v1416_v40, 0.0  ;;  %v1432_v42 = vmul.f32 0.1, %v1416_v40  ;;  %v1418_v43 = vadd.f32 %v1409_v27, %v1398_v45 }
 0x204   : > { %vm1425_vm4 = vcmp.gt.f32.partialorder %v1417_v37, 0.0  ;;  %v1433_v46 = vmul.f32 0.1, %v1417_v37  ;;  %v1419_v47 = vadd.f32 %v1413_v12, %v1399_v41  ;;  %v1527_v41 = vld [vmem:[#allocation3 + $0x18] sm:$0xff] }
 0x205   : > { %v1440_v48 = vsel %vm1424_vm11, %v1416_v40, %v1432_v42  ;;  %vm1426_vm7 = vcmp.gt.f32.partialorder %v1418_v43, 0.0  ;;  %v1434_v15 = vmul.f32 0.1, %v1418_v43 }
 0x206   : > { %v1441_v49 = vsel %vm1425_vm4, %v1417_v37, %v1433_v46  ;;  %vm1427_vm6 = vcmp.gt.f32.partialorder %v1419_v47, 0.0  ;;  %v1435_v16 = vmul.f32 0.1, %v1419_v47  ;;  %v1367_v50 = vpop.f32.mrb[4].mxu0 }
 0x207   : > { %v2790_v51 = vpack.c.bf16 %v1441_v49, %v1440_v48  ;;  %v1442_v52 = vsel %vm1426_vm7, %v1418_v43, %v1434_v15  ;;  %v1400_v53 = vmul.f32 %v1389_v22, %v1367_v50  ;;  %v1369_v56 = vpop.f32.mrb[5].mxu0 }
 0x208   : > { %v1443_v25 = vsel %vm1427_vm6, %v1419_v47, %v1435_v16  ;;  %v1401_v26 = vmul.f32 %v1393_v24, %v1369_v56  ;;  %v1371_v57 = vpop.f32.mrb[6].mxu0 }
 0x209   : > { %v1481_v58 = vshrl.u32 %v2790_v51, 16  ;;  %v2791_v59 = vpack.c.bf16 %v1443_v25, %v1442_v52  ;;  %v1420_v60 = vadd.f32 %v1409_v27, %v1400_v53  ;;  %v1373_v61 = vpop.f32.mrb[7].mxu0  ;;  %v1484_v55 = vshll.u32 %v2790_v51, 16  ;;  %v1531_v25 = vld [vmem:[#allocation3 + $0x28] sm:$0x11] }
 0x20a   : > { %v1421_v29 = vadd.f32 %v1413_v12, %v1401_v26  ;;  %v1402_v35 = vmul.f32 %v1389_v22, %v1371_v57  ;;  %v1403_v38 = vmul.f32 %v1393_v24, %v1373_v61 }
 0x20b   : > { %v1483_v62 = vrot.slane %v1481_v58, 7  ;;  %v1489_v7 = vshrl.u32 %v2791_v59, 16  ;;  %v1492_v30 = vshll.u32 %v2791_v59, 16  ;;  %vm1428_vm9 = vcmp.gt.f32.partialorder %v1420_v60, 0.0 }
 0x20c   : > { %v1436_v63 = vmul.f32 0.1, %v1420_v60  ;;  %vm1429_vm12 = vcmp.gt.f32.partialorder %v1421_v29, 0.0  ;;  %v1437_v0 = vmul.f32 0.1, %v1421_v29  ;;  %v1422_v1 = vadd.f32 %v1409_v27, %v1402_v35 }
 0x20d   : > { %v1486_v3 = vor.u32 %v1484_v55, %v1483_v62  ;;  %v1487_v31 = vrot.slane %v1483_v62, 4  ;;  %v1491_v5 = vrot.slane %v1489_v7, 7  ;;  %v1423_v32 = vadd.f32 %v1413_v12, %v1403_v38 }
 0x20e   : > { %v1444_v8 = vsel %vm1428_vm9, %v1420_v60, %v1436_v63  ;;  %v1445_v9 = vsel %vm1429_vm12, %v1421_v29, %v1437_v0  ;;  %vm1430_vm13 = vcmp.gt.f32.partialorder %v1422_v1, 0.0  ;;  %v1438_v10 = vmul.f32 0.1, %v1422_v1 }
 0x20f   : > { %v3791_v14 = vsel %vm3637_vm8, %v1486_v3, %v1520_v34  ;;  %v1494_v18 = vor.u32 %v1492_v30, %v1491_v5  ;;  %v1496_v19 = vrot.slane %v1491_v5, 4  ;;  %v2792_v20 = vpack.c.bf16 %v1445_v9, %v1444_v8 }
 0x210   : > { %1522 = vst [vmem:[#allocation3] sm:$0xff] %v3791_v14  ;;  %v1446_v17 = vsel %vm1430_vm13, %v1422_v1, %v1438_v10  ;;  %vm1431_vm14 = vcmp.gt.f32.partialorder %v1423_v32, 0.0  ;;  %v1439_v21 = vmul.f32 0.1, %v1423_v32  ;;  %v1573_v22 = vshrl.u32 %v3791_v14, 16 }
 0x211   : > { %v3797_v24 = vsel %vm3642_vm5, %v1487_v31, %v1494_v18  ;;  %v1525_v27 = vsel %vm3588_vm10, %v1496_v19, %v1524_v6  ;;  %v1498_v11 = vshrl.u32 %v2792_v20, 16  ;;  %v1501_v12 = vshll.u32 %v2792_v20, 16 }
 0x212   : > { %1526 = vst [vmem:[#allocation3 + $0x10] sm:$0x11] %v1525_v27  ;;  %v1447_v23 = vsel %vm1431_vm14, %v1423_v32, %v1439_v21  ;;  %v1575_v28 = vrot.slane %v1573_v22, 4  ;;  %v1576_v33 = vshll.u32 %v3791_v14, 16  ;;  %v1582_v39 = vshll.u32 %v3797_v24, 16 }
 0x213   : > { %v1500_v40 = vrot.slane %v1498_v11, 7  ;;  %v2793_v45 = vpack.c.bf16 %v1447_v23, %v1446_v17  ;;  %v1586_v54 = vshrl.u32 %v3797_v24, 16  ;;  %v2705_v37 = vcombine.high %v3791_v14, %v3797_v24  ;;  %v3093_v17 = vld [vmem:[#allocation9] ss:$8 sps:$4 sm:$0xff]   ;;  %v3098_v11 = vld [vmem:[#allocation9 + $0x14] ss:$8 sps:$4 sm:$0xff]  }
 0x214   : > { %v1578_v42 = vrot.slane %v1576_v33, 5  ;;  %v1584_v43 = vrot.slane %v1582_v39, 5  ;;  %v2704_v46 = vcombine.low %v3791_v14, %v3797_v24  ;;  %v2123_v15 = vrot.slane %v3797_v24, 5  ;;  %v3096_v39 = vld [vmem:[#allocation9 + $0x10] ss:$8 sps:$4 sm:$0xff]  }
 0x215   : > { %v1503_v47 = vor.u32 %v1501_v12, %v1500_v40  ;;  %v1506_v48 = vshrl.u32 %v2793_v45, 16  ;;  %v1588_v16 = vrot.slane %v1586_v54, 4  ;;  %v1504_v50 = vrot.slane %v1500_v40, 4  ;;  %v3101_v54 = vld [vmem:[#allocation9 + $0x24] ss:$8 sps:$4 sm:$0xff]  }
 0x216   : > { %v1579_v49 = vor.u32 %v1578_v42, %v1575_v28  ;;  %v1509_v53 = vshll.u32 %v2793_v45, 16  ;;  %v2125_v35 = vrot.slane %v2123_v15, 4  ;;  %v3150_v14 = vld [vmem:[#allocation9 + $0x230] ss:$8 sps:$4 sm:$0xff]   ;;  %v3155_v24 = vld [vmem:[#allocation9 + $0x244] ss:$8 sps:$4 sm:$0xff]  }
 0x217   : > { %v3811_v51 = vsel %vm3637_vm8, %v1503_v47, %v1527_v41  ;;  %v1508_v52 = vrot.slane %v1506_v48, 7  ;;  %v2115_v56 = vld [vmem:[#allocation3] sm:$0xee]  ;;  %v1589_v57 = vor.u32 %v1588_v16, %v1584_v43 }
 0x218   : > { %1529 = vst [vmem:[#allocation3 + $0x18] sm:$0xff] %v3811_v51  ;;  %v1580_v26 = vrot.slane %v1579_v49, 4  ;;  %v1597_v58 = vshrl.u32 %v3811_v51, 16  ;;  %v1600_v59 = vshll.u32 %v3811_v51, 16  ;;  %v2740_v29 = vrot.slane %v2115_v56, 9 }
 0x219   : > { %v1511_v60 = vor.u32 %v1509_v53, %v1508_v52  ;;  %v1513_v61 = vrot.slane %v1508_v52, 4  ;;  %v1570_v55 = vld [vmem:[#allocation3 + $0x10] sm:$0x11]  ;;  %v1590_v38 = vrot.slane %v1589_v57, 4  ;;  %v3104_v53 = vld [vmem:[#allocation9 + $0x34] ss:$8 sps:$4 sm:$0xff]  }
 0x21a   : > { %v1585_v2 = vsel %vm3665_vm0, %v1580_v26, %v1584_v43  ;;  %v1592_v62 = vshll.u32 %v1570_v55, 16  ;;  %v2126_v7 = vrot.slane %v1570_v55, 5  ;;  %v1599_v63 = vrot.slane %v1597_v58, 4  ;;  %v3099_v49 = vld [vmem:[#allocation9 + $0x20] ss:$8 sps:$4 sm:$0xff]  }
 0x21b   : > { %v3820_v30 = vsel %vm3642_vm5, %v1504_v50, %v1511_v60  ;;  %v1532_v34 = vsel %vm3588_vm10, %v1513_v61, %v1531_v25  ;;  %v1602_v0 = vrot.slane %v1600_v59, 5  ;;  %v3832_v6 = vsel %vm3702_vm3, %v2740_v29, %v2123_v15  ;;  %v3107_v26 = vld [vmem:[#allocation9 + $0x44] ss:$8 sps:$4 sm:$0xff]   ;;  %v3105_v57 = vld [vmem:[#allocation9 + $0x40] ss:$8 sps:$4 sm:$0xff]  }
 0x21c   : > { %1533 = vst [vmem:[#allocation3 + $0x28] sm:$0x11] %v1532_v34  ;;  %v1594_v1 = vrot.slane %v1592_v62, 5  ;;  %v1606_v3 = vshll.u32 %v3820_v30, 16  ;;  %v1610_v31 = vshrl.u32 %v3820_v30, 16  ;;  %v2707_v5 = vcombine.high %v3811_v51, %v3820_v30 }
 0x21d   : > { %v1603_v32 = vor.u32 %v1602_v0, %v1599_v63  ;;  %v2706_v4 = vcombine.low %v3811_v51, %v3820_v30  ;;  %v3836_v13 = vsel %vm3702_vm3, %v2125_v35, %v2126_v7  ;;  %v2130_v12 = vrot.slane %v3820_v30, 5  ;;  %v3110_v58 = vld [vmem:[#allocation9 + $0x54] ss:$8 sps:$4 sm:$0xff]   ;;  %v3113_v59 = vld [vmem:[#allocation9 + $0x64] ss:$8 sps:$4 sm:$0xff]  }
 0x21e   : > { %v1595_v8 = vsel %vm3665_vm0, %v1590_v38, %v1594_v1  ;;  %v1608_v9 = vrot.slane %v1606_v3, 5  ;;  %v1612_v10 = vrot.slane %v1610_v31, 4  ;;  %v2742_v18 = vcombine.low %v3832_v6, %v3836_v13  ;;  %v3111_v60 = vld [vmem:[#allocation9 + $0x60] ss:$8 sps:$4 sm:$0xff]   ;;  %v3116_v61 = vld [vmem:[#allocation9 + $0x74] ss:$8 sps:$4 sm:$0xff]  }
 0x21f   : > { %v2668_v19 = vcombine.low %v1585_v2, %v1595_v8  ;;  %v2669_v20 = vcombine.high %v1585_v2, %v1595_v8  ;;  %v1604_v21 = vrot.slane %v1603_v32, 4  ;;  %v2743_v22 = vcombine.high %v3832_v6, %v3836_v13  ;;  %v2116_v27 = vld [vmem:[#allocation3 + $0x18] sm:$0xee]  ;;  %v3114_v55 = vld [vmem:[#allocation9 + $0x70] ss:$8 sps:$4 sm:$0xff]  }
 0x220   : > { %v1613_v28 = vor.u32 %v1612_v10, %v1608_v9  ;;  %v2741_v33 = vrot.slane %v2116_v27, 9  ;;  %v2132_v41 = vrot.slane %v2130_v12, 4  ;;  %v3119_v29 = vld [vmem:[#allocation9 + $0x84] ss:$8 sps:$4 sm:$0xff]   ;;  %v3117_v35 = vld [vmem:[#allocation9 + $0x80] ss:$8 sps:$4 sm:$0xff]  }
 0x221   : > { %1861 = vmatprep.mubr.bf16.mxu1 %v2669_v20  ;;  %v1609_v23 = vsel %vm3665_vm0, %v1604_v21, %v1608_v9  ;;  %v3120_v2 = vld [vmem:[#allocation9 + $0x90] ss:$8 sps:$4 sm:$0xff]   ;;  %v3125_v38 = vld [vmem:[#allocation9 + $0xa4] ss:$8 sps:$4 sm:$0xff]   ;;  %v3123_v62 = vld [vmem:[#allocation9 + $0xa0] ss:$8 sps:$4 sm:$0xff]  }
 0x222   : > { %1862 = vmatmul.mubr.bf16.vlgmr.msra.gmra.mrb[0].mxu1 %v2668_v19  ;;  %v1614_v43 = vrot.slane %v1613_v28, 4  ;;  %v3849_v48 = vsel %vm3702_vm3, %v2741_v33, %v2130_v12  ;;  %v3128_v7 = vld [vmem:[#allocation9 + $0xb4] ss:$8 sps:$4 sm:$0xff]   ;;  %v3126_v34 = vld [vmem:[#allocation9 + $0xb0] ss:$8 sps:$4 sm:$0xff]  }
 0x223   : > { %2063 = vmatpush1.bf16.msra.mxu1 %v3093_v17  ;;  %v1571_v40 = vld [vmem:[#allocation3 + $0x28] sm:$0x11]  ;;  %v3131_v63 = vld [vmem:[#allocation9 + $0xc4] ss:$8 sps:$4 sm:$0xff]   ;;  %v3129_v0 = vld [vmem:[#allocation9 + $0xc0] ss:$8 sps:$4 sm:$0xff]  }
 0x224   : > { %2064 = vmatprep.subr.bf16.mxu1 %v3098_v11  ;;  %v1616_v45 = vshll.u32 %v1571_v40, 16  ;;  %v2133_v42 = vrot.slane %v1571_v40, 5  ;;  %v3134_v1 = vld [vmem:[#allocation9 + $0xd4] ss:$8 sps:$4 sm:$0xff]   ;;  %v3132_v3 = vld [vmem:[#allocation9 + $0xd0] ss:$8 sps:$4 sm:$0xff]  }
 0x225   : > { %v3137_v31 = vld [vmem:[#allocation9 + $0xe4] ss:$8 sps:$4 sm:$0xff]   ;;  %v3135_v32 = vld [vmem:[#allocation9 + $0xe0] ss:$8 sps:$4 sm:$0xff]   ;;  %v3140_v8 = vld [vmem:[#allocation9 + $0xf4] ss:$8 sps:$4 sm:$0xff]  }
 0x226   : > { %v1618_v47 = vrot.slane %v1616_v45, 5  ;;  %v3853_v15 = vsel %vm3702_vm3, %v2132_v41, %v2133_v42  ;;  %v3138_v9 = vld [vmem:[#allocation9 + $0xf0] ss:$8 sps:$4 sm:$0xff]   ;;  %v3143_v10 = vld [vmem:[#allocation9 + $0x204] ss:$8 sps:$4 sm:$0xff]  }
 0x227   : > { %2065 = vmatpush1.bf16.msra.mxu1 %v3096_v39  ;;  %v2745_v16 = vcombine.high %v3849_v48, %v3853_v15  ;;  %v2744_v50 = vcombine.low %v3849_v48, %v3853_v15  ;;  %v3141_v19 = vld [vmem:[#allocation9 + $0x200] ss:$8 sps:$4 sm:$0xff]   ;;  %v3146_v20 = vld [vmem:[#allocation9 + $0x214] ss:$8 sps:$4 sm:$0xff]   ;;  %v3144_v17 = vld [vmem:[#allocation9 + $0x210] ss:$8 sps:$4 sm:$0xff]  }
 0x228   : > { %v1619_v52 = vsel %vm3665_vm0, %v1614_v43, %v1618_v47  ;;  %2066 = vmatprep.subr.bf16.mxu1 %v3101_v54  ;;  %v3149_v21 = vld [vmem:[#allocation9 + $0x224] ss:$8 sps:$4 sm:$0xff]   ;;  %v3147_v27 = vld [vmem:[#allocation9 + $0x220] ss:$8 sps:$4 sm:$0xff]   ;;  %v3152_v11 = vld [vmem:[#allocation9 + $0x234] ss:$8 sps:$4 sm:$0xff]  }
 0x229   : > { %v2671_v56 = vcombine.high %v1609_v23, %v1619_v52  ;;  %v2670_v25 = vcombine.low %v1609_v23, %v1619_v52  ;;  %v3156_v12 = vld [vmem:[#allocation9 + $0x250] ss:$8 sps:$4 sm:$0xff]   ;;  %v3161_v23 = vld [vmem:[#allocation9 + $0x264] ss:$8 sps:$4 sm:$0xff]   ;;  %v3159_v28 = vld [vmem:[#allocation9 + $0x260] ss:$8 sps:$4 sm:$0xff]  }
 0x22a   : > { %v3164_v51 = vld [vmem:[#allocation9 + $0x274] ss:$8 sps:$4 sm:$0xff]   ;;  %v3162_v30 = vld [vmem:[#allocation9 + $0x270] ss:$8 sps:$4 sm:$0xff]   ;;  %v3173_v40 = vld [vmem:[#allocation9 + $0x2a4] ss:$8 sps:$4 sm:$0xff]  }
 0x22b   : > { %1871 = vmatprep.mubr.bf16.mxu1 %v2671_v56  ;;  %2067 = vmatpush1.bf16.msra.mxu1 %v3099_v49  ;;  %v3170_v33 = vld [vmem:[#allocation9 + $0x294] ss:$8 sps:$4 sm:$0xff]   ;;  %v3168_v39 = vld [vmem:[#allocation9 + $0x290] ss:$8 sps:$4 sm:$0xff]   ;;  %v3171_v45 = vld [vmem:[#allocation9 + $0x2a0] ss:$8 sps:$4 sm:$0xff]  }
 0x22c   : > { %1872 = vmatmul.mubr.bf16.gmra.mrb[4].mxu1 %v2670_v25  ;;  %2068 = vmatprep.subr.bf16.mxu1 %v3104_v53  ;;  %v3176_v54 = vld [vmem:[#allocation9 + $0x2b4] ss:$8 sps:$4 sm:$0xff]   ;;  %v3174_v41 = vld [vmem:[#allocation9 + $0x2b0] ss:$8 sps:$4 sm:$0xff]   ;;  %v3179_v42 = vld [vmem:[#allocation9 + $0x2c4] ss:$8 sps:$4 sm:$0xff]  }
 0x22d   : > { %2094 = vmatprep.mubr.bf16.mxu1 %v2705_v37  ;;  %v3122_v37 = vld [vmem:[#allocation9 + $0x94] ss:$8 sps:$4 sm:$0xff]   ;;  %v3177_v43 = vld [vmem:[#allocation9 + $0x2c0] ss:$8 sps:$4 sm:$0xff]   ;;  %v3180_v49 = vld [vmem:[#allocation9 + $0x2d0] ss:$8 sps:$4 sm:$0xff]  }
 0x22e   : > { %v3182_v47 = vld [vmem:[#allocation9 + $0x2d4] ss:$8 sps:$4 sm:$0xff]   ;;  %v3185_v52 = vld [vmem:[#allocation9 + $0x2e4] ss:$8 sps:$4 sm:$0xff]   ;;  %v3183_v53 = vld [vmem:[#allocation9 + $0x2e0] ss:$8 sps:$4 sm:$0xff]  }
 0x22f   : > { %2069 = vmatpush1.bf16.msra.mxu1 %v3102_v44  ;;  %v3188_v56 = vld [vmem:[#allocation9 + $0x2f4] ss:$8 sps:$4 sm:$0xff]   ;;  %v3186_v25 = vld [vmem:[#allocation9 + $0x2f0] ss:$8 sps:$4 sm:$0xff]   ;;  %v2405_v44 = vld [vmem:[%s3575_s21] sm:$0xff] }
 0x230   : > { %2070 = vmatprep.subr.bf16.mxu1 %v3107_v26  ;;  %v2406_v26 = vld [vmem:[%s3575_s21 + $0x8] sm:$0xff] }
 0x233   : > { %2071 = vmatpush1.bf16.msra.mxu1 %v3105_v57 }
 0x234   : > { %2072 = vmatprep.subr.bf16.mxu1 %v3110_v58  ;;  %v2407_v58 = vld [vmem:[%s3575_s21 + $0x10] sm:$0xff] }
 0x237   : > { %2073 = vmatpush1.bf16.msra.mxu1 %v3108_v36 }
 0x238   : > { %2074 = vmatprep.subr.bf16.mxu1 %v3113_v59 }
 0x23b   : > { %2075 = vmatpush1.bf16.msra.mxu1 %v3111_v60  ;;  %v2408_v60 = vld [vmem:[%s3575_s21 + $0x18] sm:$0xff] }
 0x23c   : > { %2076 = vmatprep.subr.bf16.mxu1 %v3116_v61 }
 0x23f   : > { %2077 = vmatpush1.bf16.msra.mxu1 %v3114_v55  ;;  %v2411_v55 = vld [vmem:[%s3575_s21 + $0x30] sm:$0xff] }
 0x240   : > { %2078 = vmatprep.subr.bf16.mxu1 %v3119_v29 }
 0x243   : > { %2079 = vmatpush1.bf16.msra.mxu1 %v3117_v35 }
 0x244   : > { %2080 = vmatprep.subr.bf16.mxu1 %v3122_v37  ;;  %v2412_v37 = vld [vmem:[%s3575_s21 + $0x38] sm:$0xff] }
 0x247   : > { %2081 = vmatpush1.bf16.msra.mxu1 %v3120_v2 }
 0x248   : > { %2082 = vmatprep.subr.bf16.mxu1 %v3125_v38 }
 0x24b   : > { %2083 = vmatpush1.bf16.msra.mxu1 %v3123_v62 }
 0x24c   : > { %2084 = vmatprep.subr.bf16.mxu1 %v3128_v7 }
 0x24f   : > { %2085 = vmatpush1.bf16.msra.mxu1 %v3126_v34 }
 0x250   : > { %2086 = vmatprep.subr.bf16.mxu1 %v3131_v63 }
 0x253   : > { %2087 = vmatpush1.bf16.msra.mxu1 %v3129_v0 }
 0x254   : > { %2088 = vmatprep.subr.bf16.mxu1 %v3134_v1 }
 0x257   : > { %2089 = vmatpush1.bf16.msra.mxu1 %v3132_v3 }
 0x258   : > { %2090 = vmatprep.subr.bf16.mxu1 %v3137_v31 }
 0x25b   : > { %2091 = vmatpush1.bf16.msra.mxu1 %v3135_v32 }
 0x25c   : > { %2092 = vmatprep.subr.bf16.mxu1 %v3140_v8 }
 0x25f   : > { %2093 = vmatpush1.bf16.msra.mxu1 %v3138_v9 }
 0x260   : > { %2344 = vmatprep.subr.bf16.mxu1 %v3143_v10 }
 0x262   : > { %2095 = vmatmul.mubr.bf16.vlgmr.msra.gmra.mrb[0].mxu1 %v2704_v46  ;;  %v3153_v46 = vld [vmem:[#allocation9 + $0x240] ss:$8 sps:$4 sm:$0xff]  }
 0x263   : > { %2104 = vmatprep.mubr.bf16.mxu1 %v2707_v5  ;;  %2345 = vmatpush1.bf16.msra.mxu1 %v3141_v19  ;;  %v3158_v5 = vld [vmem:[#allocation9 + $0x254] ss:$8 sps:$4 sm:$0xff]  }
 0x264   : > { %2346 = vmatprep.subr.bf16.mxu1 %v3146_v20 }
 0x267   : > { %2347 = vmatpush1.bf16.msra.mxu1 %v3144_v17 }
 0x268   : > { %2348 = vmatprep.subr.bf16.mxu1 %v3149_v21 }
 0x26a   : > { %2105 = vmatmul.mubr.bf16.gmra.mrb[4].mxu1 %v2706_v4  ;;  %v3167_v4 = vld [vmem:[#allocation9 + $0x284] ss:$8 sps:$4 sm:$0xff]  }
 0x26b   : > { %2349 = vmatpush1.bf16.msra.mxu1 %v3147_v27  ;;  %2376 = vmatprep.mubr.bf16.mxu1 %v2743_v22  ;;  %v3165_v22 = vld [vmem:[#allocation9 + $0x280] ss:$8 sps:$4 sm:$0xff]  }
 0x26c   : > { %2350 = vmatprep.subr.bf16.mxu1 %v3152_v11 }
 0x26f   : > { %2351 = vmatpush1.bf16.msra.mxu1 %v3150_v14 }
 0x270   : > { %2352 = vmatprep.subr.bf16.mxu1 %v3155_v24 }
 0x273   : > { %2353 = vmatpush1.bf16.msra.mxu1 %v3153_v46 }
 0x274   : > { %2354 = vmatprep.subr.bf16.mxu1 %v3158_v5 }
 0x277   : > { %2355 = vmatpush1.bf16.msra.mxu1 %v3156_v12 }
 0x278   : > { %2356 = vmatprep.subr.bf16.mxu1 %v3161_v23 }
 0x27b   : > { %2357 = vmatpush1.bf16.msra.mxu1 %v3159_v28 }
 0x27c   : > { %2358 = vmatprep.subr.bf16.mxu1 %v3164_v51 }
 0x27f   : > { %2359 = vmatpush1.bf16.msra.mxu1 %v3162_v30 }
 0x280   : > { %2360 = vmatprep.subr.bf16.mxu1 %v3167_v4 }
 0x283   : > { %2361 = vmatpush1.bf16.msra.mxu1 %v3165_v22 }
 0x284   : > { %2362 = vmatprep.subr.bf16.mxu1 %v3170_v33 }
 0x287   : > { %2363 = vmatpush1.bf16.msra.mxu1 %v3168_v39 }
 0x288   : > { %2364 = vmatprep.subr.bf16.mxu1 %v3173_v40 }
 0x28b   : > { %2365 = vmatpush1.bf16.msra.mxu1 %v3171_v45 }
 0x28c   : > { %2366 = vmatprep.subr.bf16.mxu1 %v3176_v54 }
 0x28f   : > { %2367 = vmatpush1.bf16.msra.mxu1 %v3174_v41 }
 0x290   : > { %2368 = vmatprep.subr.bf16.mxu1 %v3179_v42 }
 0x293   : > { %2369 = vmatpush1.bf16.msra.mxu1 %v3177_v43 }
 0x294   : > { %2370 = vmatprep.subr.bf16.mxu1 %v3182_v47 }
 0x297   : > { %2371 = vmatpush1.bf16.msra.mxu1 %v3180_v49 }
 0x298   : > { %2372 = vmatprep.subr.bf16.mxu1 %v3185_v52 }
 0x29b   : > { %2373 = vmatpush1.bf16.msra.mxu1 %v3183_v53 }
 0x29c   : > { %2374 = vmatprep.subr.bf16.mxu1 %v3188_v56 }
 0x29f   : > { %2375 = vmatpush1.bf16.msra.mxu1 %v3186_v25 }
 0x2a2   : > { %2377 = vmatmul.mubr.bf16.vlgmr.msra.gmra.mrb[0].mxu1 %v2742_v18 }
 0x2a3   : > { %2386 = vmatprep.mubr.bf16.mxu1 %v2745_v16  ;;  %v2409_v16 = vld [vmem:[%s3575_s21 + $0x20] sm:$0xff] }
 0x2aa   : > { %2387 = vmatmul.mubr.bf16.gmra.mrb[4].mxu1 %v2744_v50  ;;  %v2410_v50 = vld [vmem:[%s3575_s21 + $0x28] sm:$0xff]  ;;  %s3275_s21 = scalar_lea.vmem %s3896_s14, 1024 }
 0x2ab   : > { %p3276_p11 = scmp.ne.s32.totalorder %s3896_s14, %s3275_s21  ;;  %p3283_p9 = scmp.lt.s32.totalorder %s3281_s22, %s3275_s21 }
 0x2ad   : > { %p3277_p1 = pnand %p3276_p11, %p3978_p0  ;;  %p3284_p12 = por %p3283_p9, %p3282_p7 }
 0x2af   : > { %p3278_p3 = pneg %p3277_p1 }
 0x2b1   : > { %p3285_p2 = pnand %p3284_p12, %p3278_p3 }
 0x375   : > { %v2378_v57 = vpop.f32.mrb[0].mxu1 }
 0x376   : > { %v2413_v36 = vadd.f32 %v2405_v44, %v2378_v57  ;;  %v2380_v59 = vpop.f32.mrb[1].mxu1 }
 0x377   : > { %v2414_v6 = vadd.f32 %v2406_v26, %v2380_v59  ;;  %v2382_v13 = vpop.f32.mrb[2].mxu1 }
 0x378   : > { %2421 = vst [vmem:[%s326_s12] sm:$0xff] %v2413_v36  ;;  %v2415_v18 = vadd.f32 %v2407_v58, %v2382_v13  ;;  %v2384_v48 = vpop.f32.mrb[3].mxu1 }
 0x379   : > { %2422 = vst [vmem:[%s326_s12 + $0x8] sm:$0xff] %v2414_v6  ;;  %v2416_v15 = vadd.f32 %v2408_v60, %v2384_v48 }
 0x37a   : > { %2423 = vst [vmem:[%s326_s12 + $0x10] sm:$0xff] %v2415_v18 }
 0x37b   : > { %2424 = vst [vmem:[%s326_s12 + $0x18] sm:$0xff] %v2416_v15 }
 0x37d   : > { %v2388_v61 = vpop.f32.mrb[4].mxu1 }
 0x37e   : > { %v2417_v29 = vadd.f32 %v2409_v16, %v2388_v61  ;;  %v2390_v35 = vpop.f32.mrb[5].mxu1 }
 0x37f   : > { %v2418_v2 = vadd.f32 %v2410_v50, %v2390_v35  ;;  %v2392_v38 = vpop.f32.mrb[6].mxu1 }
 0x380   : > { %2425 = vst [vmem:[%s326_s12 + $0x20] sm:$0xff] %v2417_v29  ;;  %v2419_v62 = vadd.f32 %v2411_v55, %v2392_v38  ;;  %v2394_v7 = vpop.f32.mrb[7].mxu1 }
 0x381   : > { %2426 = vst [vmem:[%s326_s12 + $0x28] sm:$0xff] %v2418_v2  ;;  %v2420_v34 = vadd.f32 %v2412_v37, %v2394_v7 }
 0x382   : > { %2427 = vst [vmem:[%s326_s12 + $0x30] sm:$0xff] %v2419_v62 }
 0x383   : > { %2428 = vst [vmem:[%s326_s12 + $0x38] sm:$0xff] %v2420_v34 }
 0x384   : > { %3288 = shalt.err (!%p3285_p2)
}
 0x385   : > { %s3289_s10 = scalar_lea.hbm %s3901_s9, 1024  ;;  %s3293_s12 = scalar_lea.hbm %s3952_s7, 2048 }
 0x386   : > { %p3290_p13 = scmp.ne.s32.totalorder %s3901_s9, %s3289_s10  ;;  %p3294_p4 = scmp.lt.u32.totalorder %s3901_s9, %s3952_s7 }
 0x387   : > { %p3295_p5 = scmp.lt.u32.totalorder %s3293_s12, %s3289_s10  ;;  %p3297_p11 = scmp.lt.u32.totalorder %s3289_s10, %s3901_s9 }
 0x388   : > { %p3291_p6 = pnand %p3290_p13, %p3978_p0 }
 0x389   : > { %p3296_p8 = por %p3295_p5, %p3294_p4 }
 0x38a   : > { %p3292_p10 = pneg %p3291_p6 }
 0x38b   : > { %p3298_p1 = por %p3297_p11, %p3296_p8 }
 0x38d   : > { %p3299_p3 = pnand %p3298_p1, %p3292_p10 }
 0x38f   : > { %3302 = shalt.err (!%p3299_p3)
}
 0x390   : > { %s3355_s30 = smov 256   ;;  %s3356_s21 = smov 16  }
 0x391   : > { %2838 = dma.vmem_to_hbm [thread:$0]  (%p3978_p0), %s3896_s14, 1024, %s3901_s9, %s2430_s28, %s3355_s30, %s3355_s30, %s3356_s21  }
 0x392 PF: > { %s2459_s20 = sand.u32 1, %s3333_s24   ;;  %p3979_p7 = scmp.ne.s32.totalorder %s3957_s8, 0 }
 0x393   : > { %p3980_p9 = scmp.ge.s32.totalorder %s3345_s27, 2  ;;  %s2460_s11 = scalar_lea.sflag [#allocation6], %s2459_s20 }
 0x395   : > { %p2852_p12 = pnand %p3980_p9, %p3979_p7 }
 0x397   : > { %3328 = dma.done.wait (!%p2852_p12), %s2460_s11, 1024  }
 0x398   : > { %3330 = vsyncadd (!%p2852_p12), %s2460_s11, 4294966272  ;;  %p21_p2 = scmp.ge.s32.totalorder %s3507_s13, 4   ;;  %s3981_s24 = smov %s3337_s25 }
 0x399   : > { %s3982_s25 = smov %s3341_s26  ;;  %s3983_s26 = smov %s3523_s17 }
 0x39a   : > { %s3984_s27 = smov %s3507_s13  ;;  %23 = sbr.rel (!%p21_p2) target bundleno = 6 (0x6), region = 105 }
 0x3a1   :  { %2465 = vsyncpa [#allocation5], 1 }
 0x3a2   :  { %2467 = vsyncpa [#allocation5 + $0x1], 1 }
 0x3a3   :  { %2468 = vsyncpa [#allocation8], 1 }
 0x3a4   :  { %2469 = vsyncpa [#allocation6], 1 }
 0x3a5   :  { %2471 = vsyncpa [#allocation6 + $0x1], 1 }

</bundles_post_ra>
